<compile_context>
chip_gen: v7x
topology: tpu7x:2x2x1
jax: 0.10.0
libtpu: 0.0.40
codegen_flags: <defaults>
</compile_context>

<pallas_src>
import jax
import jax.numpy as jnp
from jax.experimental import pallas as pl
from jax.experimental.pallas import tpu as pltpu


# ---------------------------------------------------------------------------
# Config + padded layout constants
# ---------------------------------------------------------------------------
B, T_SRC, T_TGT = 2, 8, 8
E, H = 32, 32
SRC_VOCAB, TGT_VOCAB = 64, 64
SOS_ID = 1

BP = 8            # batch padded to the 8-sublane width
HP = 128          # hidden padded to the 128-lane width
G3 = 3 * HP       # fused gate width: [r | z | n], each gate lane-group aligned
VP = 128          # target vocab padded to 128 lanes
NEG_BIG = -1e30   # bias for padded vocab columns (never wins argmax / softmax)


def _full_spec(shape):
    """Whole-array-in-VMEM BlockSpec for a trivial grid=(1,)."""
    nd = len(shape)
    return pl.BlockSpec(shape, lambda i, _nd=nd: (0,) * _nd)


# ---------------------------------------------------------------------------
# Pallas kernels
# ---------------------------------------------------------------------------

def _gru_step(x, h, wi, wh, bi, bh):
    """Fused-gate GRU cell, PyTorch semantics (gate order r|z|n, HP lanes each)."""
    gi = jnp.dot(x, wi, preferred_element_type=jnp.float32) + bi    # (BP, 3*HP)
    gh = jnp.dot(h, wh, preferred_element_type=jnp.float32) + bh    # (BP, 3*HP)
    r = jax.nn.sigmoid(gi[:, 0:HP] + gh[:, 0:HP])
    z = jax.nn.sigmoid(gi[:, HP:2 * HP] + gh[:, HP:2 * HP])
    n = jnp.tanh(gi[:, 2 * HP:] + r * gh[:, 2 * HP:])
    return (1.0 - z) * n + z * h


def _encoder_kernel(emb_ref, wi_ref, wh_ref, bi_ref, bh_ref,
                    enc_out_ref, h_out_ref):
    """Full encoder GRU scan in one kernel; weights resident in VMEM."""
    wi, wh = wi_ref[...], wh_ref[...]
    bi, bh = bi_ref[...], bh_ref[...]
    t_src = emb_ref.shape[0]

    def step(t, h):
        h_new = _gru_step(emb_ref[t], h, wi, wh, bi, bh)    # (BP, HP)
        enc_out_ref[t] = h_new
        return h_new

    h_final = jax.lax.fori_loop(0, t_src, step,
                                jnp.zeros((BP, HP), jnp.float32))
    h_out_ref[...] = h_final


def _decoder_kernel(h0_ref, sos_emb_ref, enc_ref, dec_emb_ref,
                    wi_ref, wh_ref, bi_ref, bh_ref,
                    wc_ctx_ref, wc_y_ref, bc_ref,
                    wo_ref, bo_ref,
                    logp_ref, attn_ref, h_out_ref):
    """Full greedy decode loop: GRU + dot attention + combine + log_softmax +
    in-kernel argmax + embedding lookup (one-hot matmul), weights resident."""
    enc = enc_ref[...]                          # (BP, T_src, HP) stays in VMEM
    dec_emb = dec_emb_ref[...]                  # (VP, E)
    wi, wh, bi, bh = wi_ref[...], wh_ref[...], bi_ref[...], bh_ref[...]
    wc_ctx, wc_y, bc = wc_ctx_ref[...], wc_y_ref[...], bc_ref[...]
    wo, bo = wo_ref[...], bo_ref[...]
    t_dec = logp_ref.shape[0]
    iota_v = jax.lax.broadcasted_iota(jnp.int32, (BP, VP), 1)

    def step(d, carry):
        h, x = carry
        y = _gru_step(x, h, wi, wh, bi, bh)                      # (BP, HP)

        # Luong dot attention over the source axis (padded H columns are 0).
        s = jnp.sum(y[:, None, :] * enc, axis=-1)                # (BP, T_src)
        s = s - jnp.max(s, axis=-1, keepdims=True)
        e = jnp.exp(s)
        a = e / jnp.sum(e, axis=-1, keepdims=True)               # (BP, T_src)
        ctx = jnp.sum(a[:, :, None] * enc, axis=1)               # (BP, HP)

        # linear_out([ctx; y]) with the 2H x H weight split into two halves.
        comb = jnp.tanh(
            jnp.dot(ctx, wc_ctx, preferred_element_type=jnp.float32)
            + jnp.dot(y, wc_y, preferred_element_type=jnp.float32) + bc)

        # Output projection + log_softmax over the (padded) vocab.
        logits = jnp.dot(comb, wo, preferred_element_type=jnp.float32) + bo
        m = jnp.max(logits, axis=-1, keepdims=True)
        lse = m + jnp.log(jnp.sum(jnp.exp(logits - m), axis=-1, keepdims=True))
        logp = logits - lse                                      # (BP, VP)

        logp_ref[d] = logp
        attn_ref[d] = a

        # Greedy next token (first-max index) -> one-hot -> next embedding.
        mx = jnp.max(logp, axis=-1, keepdims=True)
        idx = jnp.min(jnp.where(logp == mx, iota_v, VP),
                      axis=-1, keepdims=True)                    # (BP, 1)
        onehot = (iota_v == idx).astype(jnp.float32)             # (BP, VP)
        x_next = jnp.dot(onehot, dec_emb,
                         preferred_element_type=jnp.float32)     # (BP, E)
        return (y, x_next)

    h_final, _ = jax.lax.fori_loop(0, t_dec, step,
                                   (h0_ref[...], sos_emb_ref[...]))
    h_out_ref[...] = h_final


# ---------------------------------------------------------------------------
# pallas_call wrappers
# ---------------------------------------------------------------------------

def _encoder_call(src_emb_tbe, gru):
    t_src = src_emb_tbe.shape[0]
    args = (src_emb_tbe, gru['wi'], gru['wh'], gru['bi'], gru['bh'])
    out_shape = (jax.ShapeDtypeStruct((t_src, BP, HP), jnp.float32),
                 jax.ShapeDtypeStruct((BP, HP), jnp.float32))
    return pl.pallas_call(
        _encoder_kernel,
        grid=(1,),
        in_specs=[_full_spec(a.shape) for a in args],
        out_specs=tuple(_full_spec(s.shape) for s in out_shape),
        out_shape=out_shape,
        compiler_params=pltpu.CompilerParams(dimension_semantics=("arbitrary",)),
    )(*args)


def _decoder_call(h0, sos_emb, enc_btc, params, t_dec):
    t_src = enc_btc.shape[1]
    g = params['dec_gru']
    args = (h0, sos_emb, enc_btc, params['dec_emb'],
            g['wi'], g['wh'], g['bi'], g['bh'],
            params['attn_wc_ctx'], params['attn_wc_y'], params['attn_bc'],
            params['out_w'], params['out_b'])
    out_shape = (jax.ShapeDtypeStruct((t_dec, BP, VP), jnp.float32),
                 jax.ShapeDtypeStruct((t_dec, BP, t_src), jnp.float32),
                 jax.ShapeDtypeStruct((BP, HP), jnp.float32))
    return pl.pallas_call(
        _decoder_kernel,
        grid=(1,),
        in_specs=[_full_spec(a.shape) for a in args],
        out_specs=tuple(_full_spec(s.shape) for s in out_shape),
        out_shape=out_shape,
        compiler_params=pltpu.CompilerParams(dimension_semantics=("arbitrary",)),
    )(*args)


# ---------------------------------------------------------------------------
# Parameter construction (deterministic, synthetic) in padded/fused layout
# ---------------------------------------------------------------------------

def _pad_to(x, shape):
    out = jnp.zeros(shape, jnp.float32)
    return out.at[tuple(slice(0, s) for s in x.shape)].set(x)


def _gru_params(key, in_dim, hid):
    """Fused & padded GRU weights: Wi (in_dim, 3*HP), Wh (HP, 3*HP), b (1, 3*HP).
    Gate order r|z|n, each gate occupies its own 128-lane group; padding is 0."""
    ks = jax.random.split(key, 4)
    scale = 1.0 / float(hid) ** 0.5
    u = lambda k, sh: (scale * jax.random.uniform(k, sh, minval=-1.0, maxval=1.0)
                       ).astype(jnp.float32)
    wi_g = u(ks[0], (3, in_dim, hid))
    wh_g = u(ks[1], (3, hid, hid))
    bi_g = u(ks[2], (3, hid))
    bh_g = u(ks[3], (3, hid))
    wi = jnp.zeros((in_dim, G3), jnp.float32)
    wh = jnp.zeros((HP, G3), jnp.float32)
    bi = jnp.zeros((1, G3), jnp.float32)
    bh = jnp.zeros((1, G3), jnp.float32)
    for gi in range(3):
        c0 = gi * HP
        wi = wi.at[:, c0:c0 + hid].set(wi_g[gi])
        wh = wh.at[:hid, c0:c0 + hid].set(wh_g[gi])
        bi = bi.at[0, c0:c0 + hid].set(bi_g[gi])
        bh = bh.at[0, c0:c0 + hid].set(bh_g[gi])
    return {'wi': wi, 'wh': wh, 'bi': bi, 'bh': bh}


def init_params(key, src_vocab, tgt_vocab, emb, hid):
    ks = jax.random.split(key, 8)
    w = lambda k, sh, s=0.1: (s * jax.random.normal(k, sh)).astype(jnp.float32)
    out_b = jnp.full((1, VP), NEG_BIG, jnp.float32).at[0, :tgt_vocab].set(0.0)
    return {
        'enc_emb': w(ks[0], (src_vocab, emb)),
        'dec_emb': _pad_to(w(ks[1], (tgt_vocab, emb)), (VP, emb)),
        'enc_gru': _gru_params(ks[2], emb, hid),
        'dec_gru': _gru_params(ks[3], emb, hid),
        'attn_wc_ctx': _pad_to(w(ks[4], (hid, hid)), (HP, HP)),
        'attn_wc_y': _pad_to(w(ks[5], (hid, hid)), (HP, HP)),
        'attn_bc': jnp.zeros((1, HP), jnp.float32),
        'out_w': _pad_to(w(ks[6], (hid, tgt_vocab)), (HP, VP)),
        'out_b': out_b,
    }


# ---------------------------------------------------------------------------
# Seq2seq forward (encoder GRU -> decoder GRU + attention + log_softmax)
# ---------------------------------------------------------------------------

@jax.jit
def seq2seq_forward(params, src_ids, tgt_ids):
    b, t_src = src_ids.shape
    t_dec = tgt_ids.shape[1] - 1

    # ---- EncoderRNN: embedding gather in XLA (one op), fused GRU scan kernel ----
    src_emb = params['enc_emb'][src_ids]                        # (B, T_src, E)
    src_emb = jnp.transpose(src_emb, (1, 0, 2))                 # (T_src, B, E)
    src_emb = jnp.pad(src_emb, ((0, 0), (0, BP - b), (0, 0)))   # (T_src, BP, E)
    enc_outs, enc_h = _encoder_call(src_emb, params['enc_gru'])
    enc_btc = jnp.transpose(enc_outs, (1, 0, 2))                # (BP, T_src, HP)

    # ---- DecoderRNN (teacher_forcing_ratio=0): greedy feedback fully in-kernel ----
    sos_emb = params['dec_emb'][tgt_ids[:, 0]]                  # (B, E) SOS column
    sos_emb = jnp.pad(sos_emb, ((0, BP - b), (0, 0)))           # (BP, E)
    logp_pad, attn_pad, dec_h = _decoder_call(enc_h, sos_emb, enc_btc, params, t_dec)

    decoder_outputs = logp_pad[:, :b, :TGT_VOCAB]               # (T_dec, B, V_tgt)
    decoder_hidden = dec_h[None, :b, :H]                        # (1, B, H)
    attentions = attn_pad[:, :b, :]                             # (T_dec, B, T_src)
    return decoder_outputs, decoder_hidden, attentions


# ---------------------------------------------------------------------------
# Main
# ---------------------------------------------------------------------------

if __name__ == "__main__":
    key = jax.random.PRNGKey(0)
    k_par, k_src, k_tgt = jax.random.split(key, 3)

    params = init_params(k_par, SRC_VOCAB, TGT_VOCAB, E, H)
    src_ids = jax.random.randint(k_src, (B, T_SRC), 3, SRC_VOCAB, dtype=jnp.int32)
    tgt_ids = jax.random.randint(k_tgt, (B, T_TGT), 3, TGT_VOCAB, dtype=jnp.int32)
    tgt_ids = tgt_ids.at[:, 0].set(SOS_ID)                      # SOS in first position

    # TODO(synk): dropout layers / variable_lengths packing / teacher-forcing
    # randomness are eval-time no-ops for this config and are not modelled.
    dec_out, dec_hidden, attn = seq2seq_forward(params, src_ids, tgt_ids)
    jax.block_until_ready((dec_out, dec_hidden, attn))

    assert dec_out.shape == (T_TGT - 1, B, TGT_VOCAB)
    assert dec_hidden.shape == (1, B, H)
    assert attn.shape == (T_TGT - 1, B, T_SRC)
    print("KERNEL_OK")
</pallas_src>

<mosaic_0001>
module attributes {stable_mosaic.version = 11 : i64} {
  func.func @_encoder_kernel(%arg0: i32, %arg1: memref<8x8x32xf32, #tpu.memory_space<vmem>>, %arg2: memref<32x384xf32, #tpu.memory_space<vmem>>, %arg3: memref<128x384xf32, #tpu.memory_space<vmem>>, %arg4: memref<1x384xf32, #tpu.memory_space<vmem>>, %arg5: memref<1x384xf32, #tpu.memory_space<vmem>>, %arg6: memref<8x8x128xf32, #tpu.memory_space<vmem>>, %arg7: memref<8x128xf32, #tpu.memory_space<vmem>>) attributes {dimension_semantics = [#tpu.dimension_semantics<arbitrary>], iteration_bounds = array<i64: 1>, scalar_prefetch = 0 : i64, scratch_operands = 0 : i64, tpu.core_type = #tpu.core_type<tc>, window_params = [{pipeline_mode = #tpu.pipeline_mode<synchronous>, transform_indices = @transform_0, window_bounds = array<i64: 8, 8, 32>}, {pipeline_mode = #tpu.pipeline_mode<synchronous>, transform_indices = @transform_1, window_bounds = array<i64: 32, 384>}, {pipeline_mode = #tpu.pipeline_mode<synchronous>, transform_indices = @transform_2, window_bounds = array<i64: 128, 384>}, {pipeline_mode = #tpu.pipeline_mode<synchronous>, transform_indices = @transform_3, window_bounds = array<i64: 1, 384>}, {pipeline_mode = #tpu.pipeline_mode<synchronous>, transform_indices = @transform_4, window_bounds = array<i64: 1, 384>}, {pipeline_mode = #tpu.pipeline_mode<synchronous>, transform_indices = @transform_5, window_bounds = array<i64: 8, 8, 128>}, {pipeline_mode = #tpu.pipeline_mode<synchronous>, transform_indices = @transform_6, window_bounds = array<i64: 8, 128>}]} {
    %c0 = arith.constant 0 : index
    %c0_0 = arith.constant 0 : index
    %0 = vector.load %arg2[%c0, %c0_0] : memref<32x384xf32, #tpu.memory_space<vmem>>, vector<32x384xf32>
    %c0_1 = arith.constant 0 : index
    %c0_2 = arith.constant 0 : index
    %1 = vector.load %arg3[%c0_1, %c0_2] : memref<128x384xf32, #tpu.memory_space<vmem>>, vector<128x384xf32>
    %c0_3 = arith.constant 0 : index
    %c0_4 = arith.constant 0 : index
    %2 = vector.load %arg4[%c0_3, %c0_4] : memref<1x384xf32, #tpu.memory_space<vmem>>, vector<1x384xf32>
    %c0_5 = arith.constant 0 : index
    %c0_6 = arith.constant 0 : index
    %3 = vector.load %arg5[%c0_5, %c0_6] : memref<1x384xf32, #tpu.memory_space<vmem>>, vector<1x384xf32>
    %cst = arith.constant 0.000000e+00 : f32
    %4 = vector.broadcast %cst : f32 to vector<8x128xf32>
    %c0_i32 = arith.constant 0 : i32
    %c8_i32 = arith.constant 8 : i32
    %5 = arith.addi %c0_i32, %c8_i32 : i32
    %c1_i32 = arith.constant 1 : i32
    %6 = scf.for %arg8 = %c0_i32 to %5 step %c1_i32 iter_args(%arg9 = %4) -> (vector<8x128xf32>)  : i32 {
      %8 = arith.index_cast %arg8 : i32 to index
      %c0_10 = arith.constant 0 : index
      %c0_11 = arith.constant 0 : index
      %9 = vector.load %arg1[%8, %c0_10, %c0_11] : memref<8x8x32xf32, #tpu.memory_space<vmem>>, vector<1x8x32xf32>
      %10 = vector.shape_cast %9 : vector<1x8x32xf32> to vector<8x32xf32>
      %cst_12 = arith.constant dense<0.000000e+00> : vector<8x384xf32>
      %11 = tpu.matmul %10, %0, %cst_12 {dimension_numbers = #tpu.dot_dimension_numbers<[1], [0], [0], [1], [0, 0, 1, 1], [], []>} : vector<8x32xf32>, vector<32x384xf32>, vector<8x384xf32> -> vector<8x384xf32>
      %12 = vector.broadcast %2 : vector<1x384xf32> to vector<8x384xf32>
      %13 = arith.addf %11, %12 : vector<8x384xf32>
      %cst_13 = arith.constant dense<0.000000e+00> : vector<8x384xf32>
      %14 = tpu.matmul %arg9, %1, %cst_13 {dimension_numbers = #tpu.dot_dimension_numbers<[1], [0], [0], [1], [0, 0, 1, 1], [], []>} : vector<8x128xf32>, vector<128x384xf32>, vector<8x384xf32> -> vector<8x384xf32>
      %15 = vector.broadcast %3 : vector<1x384xf32> to vector<8x384xf32>
      %16 = arith.addf %14, %15 : vector<8x384xf32>
      %17 = vector.extract_strided_slice %13 {offsets = [0, 0], sizes = [8, 128], strides = [1, 1]} : vector<8x384xf32> to vector<8x128xf32>
      %18 = vector.extract_strided_slice %16 {offsets = [0, 0], sizes = [8, 128], strides = [1, 1]} : vector<8x384xf32> to vector<8x128xf32>
      %19 = arith.addf %17, %18 : vector<8x128xf32>
      %20 = arith.negf %19 : vector<8x128xf32>
      %21 = math.exp %20 : vector<8x128xf32>
      %cst_14 = arith.constant 1.000000e+00 : f32
      %22 = vector.broadcast %cst_14 : f32 to vector<8x128xf32>
      %23 = arith.addf %22, %21 : vector<8x128xf32>
      %24 = arith.divf %22, %23 : vector<8x128xf32>
      %25 = vector.extract_strided_slice %13 {offsets = [0, 128], sizes = [8, 128], strides = [1, 1]} : vector<8x384xf32> to vector<8x128xf32>
      %26 = vector.extract_strided_slice %16 {offsets = [0, 128], sizes = [8, 128], strides = [1, 1]} : vector<8x384xf32> to vector<8x128xf32>
      %27 = arith.addf %25, %26 : vector<8x128xf32>
      %28 = arith.negf %27 : vector<8x128xf32>
      %29 = math.exp %28 : vector<8x128xf32>
      %cst_15 = arith.constant 1.000000e+00 : f32
      %30 = vector.broadcast %cst_15 : f32 to vector<8x128xf32>
      %31 = arith.addf %30, %29 : vector<8x128xf32>
      %32 = arith.divf %30, %31 : vector<8x128xf32>
      %33 = vector.extract_strided_slice %13 {offsets = [0, 256], sizes = [8, 128], strides = [1, 1]} : vector<8x384xf32> to vector<8x128xf32>
      %34 = vector.extract_strided_slice %16 {offsets = [0, 256], sizes = [8, 128], strides = [1, 1]} : vector<8x384xf32> to vector<8x128xf32>
      %35 = arith.mulf %24, %34 : vector<8x128xf32>
      %36 = arith.addf %33, %35 : vector<8x128xf32>
      %37 = math.tanh %36 : vector<8x128xf32>
      %cst_16 = arith.constant 1.000000e+00 : f32
      %38 = vector.broadcast %cst_16 : f32 to vector<8x128xf32>
      %39 = arith.subf %38, %32 : vector<8x128xf32>
      %40 = arith.mulf %39, %37 : vector<8x128xf32>
      %41 = arith.mulf %32, %arg9 : vector<8x128xf32>
      %42 = arith.addf %40, %41 : vector<8x128xf32>
      %43 = arith.index_cast %arg8 : i32 to index
      %c0_17 = arith.constant 0 : index
      %c0_18 = arith.constant 0 : index
      %44 = vector.load %arg6[%43, %c0_17, %c0_18] : memref<8x8x128xf32, #tpu.memory_space<vmem>>, vector<1x8x128xf32>
      %45 = vector.shape_cast %44 : vector<1x8x128xf32> to vector<8x128xf32>
      %46 = vector.shape_cast %42 : vector<8x128xf32> to vector<1x8x128xf32>
      tpu.vector_store %arg6[%43, %c0_17, %c0_18], %46 {strides = array<i32>} : memref<8x8x128xf32, #tpu.memory_space<vmem>>, vector<1x8x128xf32>,
      scf.yield %42 : vector<8x128xf32>
    }
    %c8_i32_7 = arith.constant 8 : i32
    %c0_8 = arith.constant 0 : index
    %c0_9 = arith.constant 0 : index
    %7 = vector.load %arg7[%c0_8, %c0_9] : memref<8x128xf32, #tpu.memory_space<vmem>>, vector<8x128xf32>
    tpu.vector_store %arg7[%c0_8, %c0_9], %6 {strides = array<i32>} : memref<8x128xf32, #tpu.memory_space<vmem>>, vector<8x128xf32>,
    return
  }
  func.func @transform_0(%arg0: i32) -> (i32, i32, i32) {
    %c0_i32 = arith.constant 0 : i32
    %c0_i32_0 = arith.constant 0 : i32
    %c0_i32_1 = arith.constant 0 : i32
    %c0_i32_2 = arith.constant 0 : i32
    return %c0_i32, %c0_i32_0, %c0_i32_1 : i32, i32, i32
  }
  func.func @transform_1(%arg0: i32) -> (i32, i32) {
    %c0_i32 = arith.constant 0 : i32
    %c0_i32_0 = arith.constant 0 : i32
    %c0_i32_1 = arith.constant 0 : i32
    return %c0_i32, %c0_i32_0 : i32, i32
  }
  func.func @transform_2(%arg0: i32) -> (i32, i32) {
    %c0_i32 = arith.constant 0 : i32
    %c0_i32_0 = arith.constant 0 : i32
    %c0_i32_1 = arith.constant 0 : i32
    return %c0_i32, %c0_i32_0 : i32, i32
  }
  func.func @transform_3(%arg0: i32) -> (i32, i32) {
    %c0_i32 = arith.constant 0 : i32
    %c0_i32_0 = arith.constant 0 : i32
    %c0_i32_1 = arith.constant 0 : i32
    return %c0_i32, %c0_i32_0 : i32, i32
  }
  func.func @transform_4(%arg0: i32) -> (i32, i32) {
    %c0_i32 = arith.constant 0 : i32
    %c0_i32_0 = arith.constant 0 : i32
    %c0_i32_1 = arith.constant 0 : i32
    return %c0_i32, %c0_i32_0 : i32, i32
  }
  func.func @transform_5(%arg0: i32) -> (i32, i32, i32) {
    %c0_i32 = arith.constant 0 : i32
    %c0_i32_0 = arith.constant 0 : i32
    %c0_i32_1 = arith.constant 0 : i32
    %c0_i32_2 = arith.constant 0 : i32
    return %c0_i32, %c0_i32_0, %c0_i32_1 : i32, i32, i32
  }
  func.func @transform_6(%arg0: i32) -> (i32, i32) {
    %c0_i32 = arith.constant 0 : i32
    %c0_i32_0 = arith.constant 0 : i32
    %c0_i32_1 = arith.constant 0 : i32
    return %c0_i32, %c0_i32_0 : i32, i32
  }
}

module attributes {stable_mosaic.version = 11 : i64} {
  func.func @_decoder_kernel(%arg0: i32, %arg1: memref<8x128xf32, #tpu.memory_space<vmem>>, %arg2: memref<8x32xf32, #tpu.memory_space<vmem>>, %arg3: memref<8x8x128xf32, #tpu.memory_space<vmem>>, %arg4: memref<128x32xf32, #tpu.memory_space<vmem>>, %arg5: memref<32x384xf32, #tpu.memory_space<vmem>>, %arg6: memref<128x384xf32, #tpu.memory_space<vmem>>, %arg7: memref<1x384xf32, #tpu.memory_space<vmem>>, %arg8: memref<1x384xf32, #tpu.memory_space<vmem>>, %arg9: memref<128x128xf32, #tpu.memory_space<vmem>>, %arg10: memref<128x128xf32, #tpu.memory_space<vmem>>, %arg11: memref<1x128xf32, #tpu.memory_space<vmem>>, %arg12: memref<128x128xf32, #tpu.memory_space<vmem>>, %arg13: memref<1x128xf32, #tpu.memory_space<vmem>>, %arg14: memref<7x8x128xf32, #tpu.memory_space<vmem>>, %arg15: memref<7x8x8xf32, #tpu.memory_space<vmem>>, %arg16: memref<8x128xf32, #tpu.memory_space<vmem>>) attributes {dimension_semantics = [#tpu.dimension_semantics<arbitrary>], iteration_bounds = array<i64: 1>, scalar_prefetch = 0 : i64, scratch_operands = 0 : i64, tpu.core_type = #tpu.core_type<tc>, window_params = [{pipeline_mode = #tpu.pipeline_mode<synchronous>, transform_indices = @transform_0, window_bounds = array<i64: 8, 128>}, {pipeline_mode = #tpu.pipeline_mode<synchronous>, transform_indices = @transform_1, window_bounds = array<i64: 8, 32>}, {pipeline_mode = #tpu.pipeline_mode<synchronous>, transform_indices = @transform_2, window_bounds = array<i64: 8, 8, 128>}, {pipeline_mode = #tpu.pipeline_mode<synchronous>, transform_indices = @transform_3, window_bounds = array<i64: 128, 32>}, {pipeline_mode = #tpu.pipeline_mode<synchronous>, transform_indices = @transform_4, window_bounds = array<i64: 32, 384>}, {pipeline_mode = #tpu.pipeline_mode<synchronous>, transform_indices = @transform_5, window_bounds = array<i64: 128, 384>}, {pipeline_mode = #tpu.pipeline_mode<synchronous>, transform_indices = @transform_6, window_bounds = array<i64: 1, 384>}, {pipeline_mode = #tpu.pipeline_mode<synchronous>, transform_indices = @transform_7, window_bounds = array<i64: 1, 384>}, {pipeline_mode = #tpu.pipeline_mode<synchronous>, transform_indices = @transform_8, window_bounds = array<i64: 128, 128>}, {pipeline_mode = #tpu.pipeline_mode<synchronous>, transform_indices = @transform_9, window_bounds = array<i64: 128, 128>}, {pipeline_mode = #tpu.pipeline_mode<synchronous>, transform_indices = @transform_10, window_bounds = array<i64: 1, 128>}, {pipeline_mode = #tpu.pipeline_mode<synchronous>, transform_indices = @transform_11, window_bounds = array<i64: 128, 128>}, {pipeline_mode = #tpu.pipeline_mode<synchronous>, transform_indices = @transform_12, window_bounds = array<i64: 1, 128>}, {pipeline_mode = #tpu.pipeline_mode<synchronous>, transform_indices = @transform_13, window_bounds = array<i64: 7, 8, 128>}, {pipeline_mode = #tpu.pipeline_mode<synchronous>, transform_indices = @transform_14, window_bounds = array<i64: 7, 8, 8>}, {pipeline_mode = #tpu.pipeline_mode<synchronous>, transform_indices = @transform_15, window_bounds = array<i64: 8, 128>}]} {
    %c0 = arith.constant 0 : index
    %c0_0 = arith.constant 0 : index
    %c0_1 = arith.constant 0 : index
    %0 = vector.load %arg3[%c0, %c0_0, %c0_1] : memref<8x8x128xf32, #tpu.memory_space<vmem>>, vector<8x8x128xf32>
    %c0_2 = arith.constant 0 : index
    %c0_3 = arith.constant 0 : index
    %1 = vector.load %arg4[%c0_2, %c0_3] : memref<128x32xf32, #tpu.memory_space<vmem>>, vector<128x32xf32>
    %c0_4 = arith.constant 0 : index
    %c0_5 = arith.constant 0 : index
    %2 = vector.load %arg5[%c0_4, %c0_5] : memref<32x384xf32, #tpu.memory_space<vmem>>, vector<32x384xf32>
    %c0_6 = arith.constant 0 : index
    %c0_7 = arith.constant 0 : index
    %3 = vector.load %arg6[%c0_6, %c0_7] : memref<128x384xf32, #tpu.memory_space<vmem>>, vector<128x384xf32>
    %c0_8 = arith.constant 0 : index
    %c0_9 = arith.constant 0 : index
    %4 = vector.load %arg7[%c0_8, %c0_9] : memref<1x384xf32, #tpu.memory_space<vmem>>, vector<1x384xf32>
    %c0_10 = arith.constant 0 : index
    %c0_11 = arith.constant 0 : index
    %5 = vector.load %arg8[%c0_10, %c0_11] : memref<1x384xf32, #tpu.memory_space<vmem>>, vector<1x384xf32>
    %c0_12 = arith.constant 0 : index
    %c0_13 = arith.constant 0 : index
    %6 = vector.load %arg9[%c0_12, %c0_13] : memref<128x128xf32, #tpu.memory_space<vmem>>, vector<128x128xf32>
    %c0_14 = arith.constant 0 : index
    %c0_15 = arith.constant 0 : index
    %7 = vector.load %arg10[%c0_14, %c0_15] : memref<128x128xf32, #tpu.memory_space<vmem>>, vector<128x128xf32>
    %c0_16 = arith.constant 0 : index
    %c0_17 = arith.constant 0 : index
    %8 = vector.load %arg11[%c0_16, %c0_17] : memref<1x128xf32, #tpu.memory_space<vmem>>, vector<1x128xf32>
    %c0_18 = arith.constant 0 : index
    %c0_19 = arith.constant 0 : index
    %9 = vector.load %arg12[%c0_18, %c0_19] : memref<128x128xf32, #tpu.memory_space<vmem>>, vector<128x128xf32>
    %c0_20 = arith.constant 0 : index
    %c0_21 = arith.constant 0 : index
    %10 = vector.load %arg13[%c0_20, %c0_21] : memref<1x128xf32, #tpu.memory_space<vmem>>, vector<1x128xf32>
    %11 = tpu.iota {dimensions = array<i32: 1>} : vector<8x128xi32>
    %c0_22 = arith.constant 0 : index
    %c0_23 = arith.constant 0 : index
    %12 = vector.load %arg1[%c0_22, %c0_23] : memref<8x128xf32, #tpu.memory_space<vmem>>, vector<8x128xf32>
    %c0_24 = arith.constant 0 : index
    %c0_25 = arith.constant 0 : index
    %13 = vector.load %arg2[%c0_24, %c0_25] : memref<8x32xf32, #tpu.memory_space<vmem>>, vector<8x32xf32>
    %c0_i32 = arith.constant 0 : i32
    %c7_i32 = arith.constant 7 : i32
    %14 = arith.addi %c0_i32, %c7_i32 : i32
    %c1_i32 = arith.constant 1 : i32
    %15:2 = scf.for %arg17 = %c0_i32 to %14 step %c1_i32 iter_args(%arg18 = %12, %arg19 = %13) -> (vector<8x128xf32>, vector<8x32xf32>)  : i32 {
      %cst = arith.constant dense<0.000000e+00> : vector<8x384xf32>
      %17 = tpu.matmul %arg19, %2, %cst {dimension_numbers = #tpu.dot_dimension_numbers<[1], [0], [0], [1], [0, 0, 1, 1], [], []>} : vector<8x32xf32>, vector<32x384xf32>, vector<8x384xf32> -> vector<8x384xf32>
      %18 = vector.broadcast %4 : vector<1x384xf32> to vector<8x384xf32>
      %19 = arith.addf %17, %18 : vector<8x384xf32>
      %cst_29 = arith.constant dense<0.000000e+00> : vector<8x384xf32>
      %20 = tpu.matmul %arg18, %3, %cst_29 {dimension_numbers = #tpu.dot_dimension_numbers<[1], [0], [0], [1], [0, 0, 1, 1], [], []>} : vector<8x128xf32>, vector<128x384xf32>, vector<8x384xf32> -> vector<8x384xf32>
      %21 = vector.broadcast %5 : vector<1x384xf32> to vector<8x384xf32>
      %22 = arith.addf %20, %21 : vector<8x384xf32>
      %23 = vector.extract_strided_slice %19 {offsets = [0, 0], sizes = [8, 128], strides = [1, 1]} : vector<8x384xf32> to vector<8x128xf32>
      %24 = vector.extract_strided_slice %22 {offsets = [0, 0], sizes = [8, 128], strides = [1, 1]} : vector<8x384xf32> to vector<8x128xf32>
      %25 = arith.addf %23, %24 : vector<8x128xf32>
      %26 = arith.negf %25 : vector<8x128xf32>
      %27 = math.exp %26 : vector<8x128xf32>
      %cst_30 = arith.constant 1.000000e+00 : f32
      %28 = vector.broadcast %cst_30 : f32 to vector<8x128xf32>
      %29 = arith.addf %28, %27 : vector<8x128xf32>
      %30 = arith.divf %28, %29 : vector<8x128xf32>
      %31 = vector.extract_strided_slice %19 {offsets = [0, 128], sizes = [8, 128], strides = [1, 1]} : vector<8x384xf32> to vector<8x128xf32>
      %32 = vector.extract_strided_slice %22 {offsets = [0, 128], sizes = [8, 128], strides = [1, 1]} : vector<8x384xf32> to vector<8x128xf32>
      %33 = arith.addf %31, %32 : vector<8x128xf32>
      %34 = arith.negf %33 : vector<8x128xf32>
      %35 = math.exp %34 : vector<8x128xf32>
      %cst_31 = arith.constant 1.000000e+00 : f32
      %36 = vector.broadcast %cst_31 : f32 to vector<8x128xf32>
      %37 = arith.addf %36, %35 : vector<8x128xf32>
      %38 = arith.divf %36, %37 : vector<8x128xf32>
      %39 = vector.extract_strided_slice %19 {offsets = [0, 256], sizes = [8, 128], strides = [1, 1]} : vector<8x384xf32> to vector<8x128xf32>
      %40 = vector.extract_strided_slice %22 {offsets = [0, 256], sizes = [8, 128], strides = [1, 1]} : vector<8x384xf32> to vector<8x128xf32>
      %41 = arith.mulf %30, %40 : vector<8x128xf32>
      %42 = arith.addf %39, %41 : vector<8x128xf32>
      %43 = math.tanh %42 : vector<8x128xf32>
      %cst_32 = arith.constant 1.000000e+00 : f32
      %44 = vector.broadcast %cst_32 : f32 to vector<8x128xf32>
      %45 = arith.subf %44, %38 : vector<8x128xf32>
      %46 = arith.mulf %45, %43 : vector<8x128xf32>
      %47 = arith.mulf %38, %arg18 : vector<8x128xf32>
      %48 = arith.addf %46, %47 : vector<8x128xf32>
      %49 = vector.shape_cast %48 : vector<8x128xf32> to vector<8x1x128xf32>
      %50 = vector.broadcast %49 : vector<8x1x128xf32> to vector<8x8x128xf32>
      %51 = arith.mulf %50, %0 : vector<8x8x128xf32>
      %cst_33 = arith.constant dense<0.000000e+00> : vector<8x8xf32>
      %52 = vector.multi_reduction <add>, %51, %cst_33 [2] : vector<8x8x128xf32> to vector<8x8xf32>
      %cst_34 = arith.constant dense<0xFF800000> : vector<8xf32>
      %53 = vector.multi_reduction <maximumf>, %52, %cst_34 [1] : vector<8x8xf32> to vector<8xf32>
      %54 = vector.shape_cast %53 : vector<8xf32> to vector<8x1xf32>
      %55 = vector.broadcast %54 : vector<8x1xf32> to vector<8x8xf32>
      %56 = arith.subf %52, %55 : vector<8x8xf32>
      %57 = math.exp %56 : vector<8x8xf32>
      %cst_35 = arith.constant dense<0.000000e+00> : vector<8xf32>
      %58 = vector.multi_reduction <add>, %57, %cst_35 [1] : vector<8x8xf32> to vector<8xf32>
      %59 = vector.shape_cast %58 : vector<8xf32> to vector<8x1xf32>
      %60 = vector.broadcast %59 : vector<8x1xf32> to vector<8x8xf32>
      %61 = arith.divf %57, %60 : vector<8x8xf32>
      %62 = vector.shape_cast %61 : vector<8x8xf32> to vector<8x8x1xf32>
      %63 = vector.broadcast %62 : vector<8x8x1xf32> to vector<8x8x128xf32>
      %64 = arith.mulf %63, %0 : vector<8x8x128xf32>
      %cst_36 = arith.constant dense<0.000000e+00> : vector<8x128xf32>
      %65 = vector.multi_reduction <add>, %64, %cst_36 [1] : vector<8x8x128xf32> to vector<8x128xf32>
      %cst_37 = arith.constant dense<0.000000e+00> : vector<8x128xf32>
      %66 = tpu.matmul %65, %6, %cst_37 {dimension_numbers = #tpu.dot_dimension_numbers<[1], [0], [0], [1], [0, 0, 1, 1], [], []>} : vector<8x128xf32>, vector<128x128xf32>, vector<8x128xf32> -> vector<8x128xf32>
      %cst_38 = arith.constant dense<0.000000e+00> : vector<8x128xf32>
      %67 = tpu.matmul %48, %7, %cst_38 {dimension_numbers = #tpu.dot_dimension_numbers<[1], [0], [0], [1], [0, 0, 1, 1], [], []>} : vector<8x128xf32>, vector<128x128xf32>, vector<8x128xf32> -> vector<8x128xf32>
      %68 = arith.addf %66, %67 : vector<8x128xf32>
      %69 = vector.broadcast %8 : vector<1x128xf32> to vector<8x128xf32>
      %70 = arith.addf %68, %69 : vector<8x128xf32>
      %71 = math.tanh %70 : vector<8x128xf32>
      %cst_39 = arith.constant dense<0.000000e+00> : vector<8x128xf32>
      %72 = tpu.matmul %71, %9, %cst_39 {dimension_numbers = #tpu.dot_dimension_numbers<[1], [0], [0], [1], [0, 0, 1, 1], [], []>} : vector<8x128xf32>, vector<128x128xf32>, vector<8x128xf32> -> vector<8x128xf32>
      %73 = vector.broadcast %10 : vector<1x128xf32> to vector<8x128xf32>
      %74 = arith.addf %72, %73 : vector<8x128xf32>
      %cst_40 = arith.constant dense<0xFF800000> : vector<8xf32>
      %75 = vector.multi_reduction <maximumf>, %74, %cst_40 [1] : vector<8x128xf32> to vector<8xf32>
      %76 = vector.shape_cast %75 : vector<8xf32> to vector<8x1xf32>
      %77 = vector.broadcast %76 : vector<8x1xf32> to vector<8x128xf32>
      %78 = arith.subf %74, %77 : vector<8x128xf32>
      %79 = math.exp %78 : vector<8x128xf32>
      %cst_41 = arith.constant dense<0.000000e+00> : vector<8xf32>
      %80 = vector.multi_reduction <add>, %79, %cst_41 [1] : vector<8x128xf32> to vector<8xf32>
      %81 = vector.shape_cast %80 : vector<8xf32> to vector<8x1xf32>
      %82 = math.log %81 : vector<8x1xf32>
      %83 = arith.addf %76, %82 : vector<8x1xf32>
      %84 = vector.broadcast %83 : vector<8x1xf32> to vector<8x128xf32>
      %85 = arith.subf %74, %84 : vector<8x128xf32>
      %86 = arith.index_cast %arg17 : i32 to index
      %c0_42 = arith.constant 0 : index
      %c0_43 = arith.constant 0 : index
      %87 = vector.load %arg14[%86, %c0_42, %c0_43] : memref<7x8x128xf32, #tpu.memory_space<vmem>>, vector<1x8x128xf32>
      %88 = vector.shape_cast %87 : vector<1x8x128xf32> to vector<8x128xf32>
      %89 = vector.shape_cast %85 : vector<8x128xf32> to vector<1x8x128xf32>
      tpu.vector_store %arg14[%86, %c0_42, %c0_43], %89 {strides = array<i32>} : memref<7x8x128xf32, #tpu.memory_space<vmem>>, vector<1x8x128xf32>,
      %90 = arith.index_cast %arg17 : i32 to index
      %c0_44 = arith.constant 0 : index
      %c0_45 = arith.constant 0 : index
      %91 = vector.load %arg15[%90, %c0_44, %c0_45] : memref<7x8x8xf32, #tpu.memory_space<vmem>>, vector<1x8x8xf32>
      %92 = vector.shape_cast %91 : vector<1x8x8xf32> to vector<8x8xf32>
      %93 = vector.shape_cast %61 : vector<8x8xf32> to vector<1x8x8xf32>
      tpu.vector_store %arg15[%90, %c0_44, %c0_45], %93 {strides = array<i32>} : memref<7x8x8xf32, #tpu.memory_space<vmem>>, vector<1x8x8xf32>,
      %cst_46 = arith.constant dense<0xFF800000> : vector<8xf32>
      %94 = vector.multi_reduction <maximumf>, %85, %cst_46 [1] : vector<8x128xf32> to vector<8xf32>
      %95 = vector.shape_cast %94 : vector<8xf32> to vector<8x1xf32>
      %96 = vector.broadcast %95 : vector<8x1xf32> to vector<8x128xf32>
      %97 = arith.cmpf oeq, %85, %96 : vector<8x128xf32>
      %c128_i32 = arith.constant 128 : i32
      %98 = vector.broadcast %c128_i32 : i32 to vector<8x128xi32>
      %99 = arith.select %97, %11, %98 : vector<8x128xi1>, vector<8x128xi32>
      %cst_47 = arith.constant dense<2147483647> : vector<8xi32>
      %100 = vector.multi_reduction <minsi>, %99, %cst_47 [1] : vector<8x128xi32> to vector<8xi32>
      %101 = vector.shape_cast %100 : vector<8xi32> to vector<8x1xi32>
      %102 = vector.broadcast %101 : vector<8x1xi32> to vector<8x128xi32>
      %103 = arith.cmpi eq, %11, %102 : vector<8x128xi32>
      %104 = arith.extui %103 : vector<8x128xi1> to vector<8x128xi32>
      %105 = arith.sitofp %104 : vector<8x128xi32> to vector<8x128xf32>
      %cst_48 = arith.constant dense<0.000000e+00> : vector<8x32xf32>
      %106 = tpu.matmul %105, %1, %cst_48 {dimension_numbers = #tpu.dot_dimension_numbers<[1], [0], [0], [1], [0, 0, 1, 1], [], []>} : vector<8x128xf32>, vector<128x32xf32>, vector<8x32xf32> -> vector<8x32xf32>
      scf.yield %48, %106 : vector<8x128xf32>, vector<8x32xf32>
    }
    %c7_i32_26 = arith.constant 7 : i32
    %c0_27 = arith.constant 0 : index
    %c0_28 = arith.constant 0 : index
    %16 = vector.load %arg16[%c0_27, %c0_28] : memref<8x128xf32, #tpu.memory_space<vmem>>, vector<8x128xf32>
    tpu.vector_store %arg16[%c0_27, %c0_28], %15#0 {strides = array<i32>} : memref<8x128xf32, #tpu.memory_space<vmem>>, vector<8x128xf32>,
    return
  }
  func.func @transform_0(%arg0: i32) -> (i32, i32) {
    %c0_i32 = arith.constant 0 : i32
    %c0_i32_0 = arith.constant 0 : i32
    %c0_i32_1 = arith.constant 0 : i32
    return %c0_i32, %c0_i32_0 : i32, i32
  }
  func.func @transform_1(%arg0: i32) -> (i32, i32) {
    %c0_i32 = arith.constant 0 : i32
    %c0_i32_0 = arith.constant 0 : i32
    %c0_i32_1 = arith.constant 0 : i32
    return %c0_i32, %c0_i32_0 : i32, i32
  }
  func.func @transform_2(%arg0: i32) -> (i32, i32, i32) {
    %c0_i32 = arith.constant 0 : i32
    %c0_i32_0 = arith.constant 0 : i32
    %c0_i32_1 = arith.constant 0 : i32
    %c0_i32_2 = arith.constant 0 : i32
    return %c0_i32, %c0_i32_0, %c0_i32_1 : i32, i32, i32
  }
  func.func @transform_3(%arg0: i32) -> (i32, i32) {
    %c0_i32 = arith.constant 0 : i32
    %c0_i32_0 = arith.constant 0 : i32
    %c0_i32_1 = arith.constant 0 : i32
    return %c0_i32, %c0_i32_0 : i32, i32
  }
  func.func @transform_4(%arg0: i32) -> (i32, i32) {
    %c0_i32 = arith.constant 0 : i32
    %c0_i32_0 = arith.constant 0 : i32
    %c0_i32_1 = arith.constant 0 : i32
    return %c0_i32, %c0_i32_0 : i32, i32
  }
  func.func @transform_5(%arg0: i32) -> (i32, i32) {
    %c0_i32 = arith.constant 0 : i32
    %c0_i32_0 = arith.constant 0 : i32
    %c0_i32_1 = arith.constant 0 : i32
    return %c0_i32, %c0_i32_0 : i32, i32
  }
  func.func @transform_6(%arg0: i32) -> (i32, i32) {
    %c0_i32 = arith.constant 0 : i32
    %c0_i32_0 = arith.constant 0 : i32
    %c0_i32_1 = arith.constant 0 : i32
    return %c0_i32, %c0_i32_0 : i32, i32
  }
  func.func @transform_7(%arg0: i32) -> (i32, i32) {
    %c0_i32 = arith.constant 0 : i32
    %c0_i32_0 = arith.constant 0 : i32
    %c0_i32_1 = arith.constant 0 : i32
    return %c0_i32, %c0_i32_0 : i32, i32
  }
  func.func @transform_8(%arg0: i32) -> (i32, i32) {
    %c0_i32 = arith.constant 0 : i32
    %c0_i32_0 = arith.constant 0 : i32
    %c0_i32_1 = arith.constant 0 : i32
    return %c0_i32, %c0_i32_0 : i32, i32
  }
  func.func @transform_9(%arg0: i32) -> (i32, i32) {
    %c0_i32 = arith.constant 0 : i32
    %c0_i32_0 = arith.constant 0 : i32
    %c0_i32_1 = arith.constant 0 : i32
    return %c0_i32, %c0_i32_0 : i32, i32
  }
  func.func @transform_10(%arg0: i32) -> (i32, i32) {
    %c0_i32 = arith.constant 0 : i32
    %c0_i32_0 = arith.constant 0 : i32
    %c0_i32_1 = arith.constant 0 : i32
    return %c0_i32, %c0_i32_0 : i32, i32
  }
  func.func @transform_11(%arg0: i32) -> (i32, i32) {
    %c0_i32 = arith.constant 0 : i32
    %c0_i32_0 = arith.constant 0 : i32
    %c0_i32_1 = arith.constant 0 : i32
    return %c0_i32, %c0_i32_0 : i32, i32
  }
  func.func @transform_12(%arg0: i32) -> (i32, i32) {
    %c0_i32 = arith.constant 0 : i32
    %c0_i32_0 = arith.constant 0 : i32
    %c0_i32_1 = arith.constant 0 : i32
    return %c0_i32, %c0_i32_0 : i32, i32
  }
  func.func @transform_13(%arg0: i32) -> (i32, i32, i32) {
    %c0_i32 = arith.constant 0 : i32
    %c0_i32_0 = arith.constant 0 : i32
    %c0_i32_1 = arith.constant 0 : i32
    %c0_i32_2 = arith.constant 0 : i32
    return %c0_i32, %c0_i32_0, %c0_i32_1 : i32, i32, i32
  }
  func.func @transform_14(%arg0: i32) -> (i32, i32, i32) {
    %c0_i32 = arith.constant 0 : i32
    %c0_i32_0 = arith.constant 0 : i32
    %c0_i32_1 = arith.constant 0 : i32
    %c0_i32_2 = arith.constant 0 : i32
    return %c0_i32, %c0_i32_0, %c0_i32_1 : i32, i32, i32
  }
  func.func @transform_15(%arg0: i32) -> (i32, i32) {
    %c0_i32 = arith.constant 0 : i32
    %c0_i32_0 = arith.constant 0 : i32
    %c0_i32_1 = arith.constant 0 : i32
    return %c0_i32, %c0_i32_0 : i32, i32
  }
}

</mosaic_0001>

<bundles_post_ra>
// kernel: seq2seq_forward.2
= control target key start
LH: loop header
LB: loop body
LE: loop exit
PB: predicated region body
PF: predicated region fallthrough
CT: control target
= control target key end

     0   :  { %12 = vsyncpa [#allocation3], 0  ;;  %s692_s21 = smov [#allocation2]   ;;  %s1129_s0 = inlined_call_operand.vmem [shape: f32[8,8,32], index: 0, kind: input, shape index: {}]   ;;  %s1130_s1 = inlined_call_operand.hbm [shape: f32[32,384], index: 1, kind: input, shape index: {}]   ;;  %s1131_s2 = inlined_call_operand.vmem [shape: f32[128,384], index: 2, kind: input, shape index: {}]   ;;  %s1132_s3 = inlined_call_operand.vmem [shape: f32[1,384], index: 3, kind: input, shape index: {}]   ;;  %s1133_s4 = inlined_call_operand.vmem [shape: f32[1,384], index: 4, kind: input, shape index: {}]   ;;  %s1134_s5 = inlined_call_operand.vmem [shape: f32[8,8,128], index: 5, kind: output, shape index: {0}]   ;;  %s1135_s6 = inlined_call_operand.vmem [shape: f32[8,128], index: 6, kind: output, shape index: {1}]  }
   0x1   :  { %s20_s22 = sshll.u32 %s692_s21, 4  ;;  %s652_s25 = scalar_lea.hbm %s1130_s1, 1536  ;;  %s21_s22 = int_to_ptr.vmem [resolvable:$true] %s20_s22 }
   0x2   :  { %p653_p0 = scmp.ne.s32.totalorder %s1130_s1, %s652_s25  ;;  %p656_p1 = scmp.lt.u32.totalorder %s652_s25, %s1130_s1 }
   0x4   :  { %p658_p2 = pnand %p656_p1, %p653_p0 }
   0x6   :  { %661 = shalt.err (!%p658_p2)
}
   0x7   :  { %s662_s30 = scalar_lea.vmem %s21_s22, 1536  ;;  %p667_p4 = scmp.lt.s32.totalorder %s21_s22, %s21_s22 }
   0x8   :  { %p663_p3 = scmp.ne.s32.totalorder %s21_s22, %s662_s30  ;;  %p668_p5 = scmp.lt.s32.totalorder %s662_s30, %s662_s30 }
   0xa   :  { %p669_p6 = por %p668_p5, %p667_p4 }
   0xc   :  { %p670_p7 = pnand %p669_p6, %p663_p3 }
   0xe   :  { %673 = shalt.err (!%p670_p7)
}
   0xf   :  { %s693_s7 = smov 384   ;;  %s694_s8 = smov 24  }
  0x10   :  { %26 = dma.hbm_to_vmem [thread:$0]  %s1130_s1, 1536, %s21_s22, [#allocation3], %s693_s7, %s693_s7, %s694_s8  }
  0x11   :  { %682 = dma.done.wait [#allocation3], 1536  }
  0x12   :  { %683 = vsyncadd [#allocation3], 4294965760  ;;  %v745_v0 = vld [vmem:[#allocation2] sm:$0xff]  ;;  %v747_v1 = vld [vmem:[#allocation2 + $0x8] sm:$0xff]  ;;  %v1019_v62 = vmov 0.0   ;;  %s1021_s1 = smov 0  }
  0x13   :  { %1139 = vst [vmem:[#allocation5_spill] sm:$0xff] %v745_v0  ;;  %1140 = vst [vmem:[#allocation6_spill] sm:$0xff] %v747_v1  ;;  %v749_v2 = vld [vmem:[#allocation2 + $0x10] sm:$0xff]  ;;  %v751_v3 = vld [vmem:[#allocation2 + $0x18] sm:$0xff] }
  0x14   :  { %1141 = vst [vmem:[#allocation7_spill] sm:$0xff] %v749_v2  ;;  %1142 = vst [vmem:[#allocation8_spill] sm:$0xff] %v751_v3  ;;  %v753_v4 = vld [vmem:[#allocation2 + $0x20] sm:$0xff]  ;;  %v755_v5 = vld [vmem:[#allocation2 + $0x28] sm:$0xff] }
  0x15   :  { %1143 = vst [vmem:[#allocation9_spill] sm:$0xff] %v753_v4  ;;  %1144 = vst [vmem:[#allocation10_spill] sm:$0xff] %v755_v5  ;;  %v757_v6 = vld [vmem:[#allocation2 + $0x30] sm:$0xff]  ;;  %v759_v7 = vld [vmem:[#allocation2 + $0x38] sm:$0xff] }
  0x16   :  { %1145 = vst [vmem:[#allocation11_spill] sm:$0xff] %v757_v6  ;;  %1146 = vst [vmem:[#allocation12_spill] sm:$0xff] %v759_v7  ;;  %v761_v8 = vld [vmem:[#allocation2 + $0x40] sm:$0xff]  ;;  %v763_v9 = vld [vmem:[#allocation2 + $0x48] sm:$0xff] }
  0x17   :  { %1147 = vst [vmem:[#allocation13_spill] sm:$0xff] %v761_v8  ;;  %1148 = vst [vmem:[#allocation14_spill] sm:$0xff] %v763_v9  ;;  %v765_v10 = vld [vmem:[#allocation2 + $0x50] sm:$0xff]  ;;  %v767_v11 = vld [vmem:[#allocation2 + $0x58] sm:$0xff] }
  0x18   :  { %1149 = vst [vmem:[#allocation15_spill] sm:$0xff] %v765_v10  ;;  %1150 = vst [vmem:[#allocation16_spill] sm:$0xff] %v767_v11  ;;  %v772_v12 = vld [vmem:[%s1131_s2] sm:$0xff]  ;;  %v777_v13 = vld [vmem:[%s1131_s2 + $0x8] sm:$0xff] }
  0x19   :  { %1151 = vst [vmem:[#allocation17_spill] sm:$0xff] %v772_v12  ;;  %1152 = vst [vmem:[#allocation18_spill] sm:$0xff] %v777_v13  ;;  %v782_v14 = vld [vmem:[%s1131_s2 + $0x10] sm:$0xff]  ;;  %v787_v15 = vld [vmem:[%s1131_s2 + $0x18] sm:$0xff] }
  0x1a   :  { %1153 = vst [vmem:[#allocation19_spill] sm:$0xff] %v782_v14  ;;  %1154 = vst [vmem:[#allocation20_spill] sm:$0xff] %v787_v15  ;;  %v792_v16 = vld [vmem:[%s1131_s2 + $0x20] sm:$0xff]  ;;  %v797_v17 = vld [vmem:[%s1131_s2 + $0x28] sm:$0xff] }
  0x1b   :  { %1155 = vst [vmem:[#allocation21_spill] sm:$0xff] %v792_v16  ;;  %1156 = vst [vmem:[#allocation22_spill] sm:$0xff] %v797_v17  ;;  %v802_v18 = vld [vmem:[%s1131_s2 + $0x30] sm:$0xff]  ;;  %v807_v19 = vld [vmem:[%s1131_s2 + $0x38] sm:$0xff] }
  0x1c   :  { %v812_v20 = vld [vmem:[%s1131_s2 + $0x40] sm:$0xff]  ;;  %v817_v21 = vld [vmem:[%s1131_s2 + $0x48] sm:$0xff]  ;;  %v822_v22 = vld [vmem:[%s1131_s2 + $0x50] sm:$0xff] }
  0x1d   :  { %v827_v23 = vld [vmem:[%s1131_s2 + $0x58] sm:$0xff]  ;;  %v832_v24 = vld [vmem:[%s1131_s2 + $0x60] sm:$0xff]  ;;  %v837_v25 = vld [vmem:[%s1131_s2 + $0x68] sm:$0xff] }
  0x1e   :  { %v842_v26 = vld [vmem:[%s1131_s2 + $0x70] sm:$0xff]  ;;  %v847_v27 = vld [vmem:[%s1131_s2 + $0x78] sm:$0xff]  ;;  %v852_v28 = vld [vmem:[%s1131_s2 + $0x80] sm:$0xff] }
  0x1f   :  { %v857_v29 = vld [vmem:[%s1131_s2 + $0x88] sm:$0xff]  ;;  %v862_v30 = vld [vmem:[%s1131_s2 + $0x90] sm:$0xff]  ;;  %v867_v31 = vld [vmem:[%s1131_s2 + $0x98] sm:$0xff] }
  0x20   :  { %v872_v32 = vld [vmem:[%s1131_s2 + $0xa0] sm:$0xff]  ;;  %v877_v33 = vld [vmem:[%s1131_s2 + $0xa8] sm:$0xff]  ;;  %v882_v34 = vld [vmem:[%s1131_s2 + $0xb0] sm:$0xff] }
  0x21   :  { %v887_v35 = vld [vmem:[%s1131_s2 + $0xb8] sm:$0xff]  ;;  %v892_v36 = vld [vmem:[%s1131_s2 + $0xc0] sm:$0xff]  ;;  %v897_v37 = vld [vmem:[%s1131_s2 + $0xc8] sm:$0xff] }
  0x22   :  { %v902_v38 = vld [vmem:[%s1131_s2 + $0xd0] sm:$0xff]  ;;  %v907_v39 = vld [vmem:[%s1131_s2 + $0xd8] sm:$0xff]  ;;  %v912_v40 = vld [vmem:[%s1131_s2 + $0xe0] sm:$0xff] }
  0x23   :  { %v917_v41 = vld [vmem:[%s1131_s2 + $0xe8] sm:$0xff]  ;;  %v922_v42 = vld [vmem:[%s1131_s2 + $0xf0] sm:$0xff]  ;;  %v927_v43 = vld [vmem:[%s1131_s2 + $0xf8] sm:$0xff] }
  0x24   :  { %v932_v44 = vld [vmem:[%s1131_s2 + $0x100] sm:$0xff]  ;;  %v937_v45 = vld [vmem:[%s1131_s2 + $0x108] sm:$0xff]  ;;  %v942_v46 = vld [vmem:[%s1131_s2 + $0x110] sm:$0xff] }
  0x25   :  { %v947_v47 = vld [vmem:[%s1131_s2 + $0x118] sm:$0xff]  ;;  %v952_v48 = vld [vmem:[%s1131_s2 + $0x120] sm:$0xff]  ;;  %v957_v49 = vld [vmem:[%s1131_s2 + $0x128] sm:$0xff] }
  0x26   :  { %v962_v50 = vld [vmem:[%s1131_s2 + $0x130] sm:$0xff]  ;;  %v967_v51 = vld [vmem:[%s1131_s2 + $0x138] sm:$0xff]  ;;  %v972_v52 = vld [vmem:[%s1131_s2 + $0x140] sm:$0xff] }
  0x27   :  { %v977_v53 = vld [vmem:[%s1131_s2 + $0x148] sm:$0xff]  ;;  %v982_v54 = vld [vmem:[%s1131_s2 + $0x150] sm:$0xff]  ;;  %v987_v55 = vld [vmem:[%s1131_s2 + $0x158] sm:$0xff] }
  0x28   :  { %v992_v56 = vld [vmem:[%s1131_s2 + $0x160] sm:$0xff]  ;;  %v997_v57 = vld [vmem:[%s1131_s2 + $0x168] sm:$0xff]  ;;  %v1002_v58 = vld [vmem:[%s1131_s2 + $0x170] sm:$0xff] }
  0x29   :  { %1157 = vst [vmem:[#allocation23_spill] sm:$0xff] %v992_v56  ;;  %v1007_v59 = vld [vmem:[%s1131_s2 + $0x178] sm:$0xff]  ;;  %v1012_v60 = vld [vmem:[%s1132_s3] sm:$0x7] }
  0x2a   :  { %1158 = vst [vmem:[#allocation24_spill] sm:$0xff] %v1007_v59  ;;  %1159 = vst [vmem:[#allocation25_spill] sm:$0xff] %v1012_v60  ;;  %v1017_v61 = vld [vmem:[%s1133_s4] sm:$0x7] }
  0x2b   :  { %1160 = vst [vmem:[#allocation26_spill] sm:$0xff] %v1017_v61 }
  0x2c LB: > { %1161 = vst [vmem:[#allocation27_spill] sm:$0xff] %v686_v62  ;;  %v1162_v1 = vld [vmem:[#allocation6_spill] sm:$0xff]  ;;  %v1163_v4 = vld [vmem:[#allocation9_spill] sm:$0xff]  ;;  %v1165_v3 = vld [vmem:[#allocation8_spill] sm:$0xff]  ;;  %v695_v59 = vmov 0.0   ;;  %s471_s2 = sshll.u32 %s690_s1, 3  ;;  %s690_s1 = sphi %s1021_s1, %s103_s1   ;;  %v686_v62 = vphi %v1019_v62, %v1185_v62  }
  0x2d   : > { %v544_v63 = vpack.c.bf16 %v1163_v4, %v1162_v1  ;;  %v1164_v0 = vld [vmem:[#allocation5_spill] sm:$0xff]  ;;  %v1166_v7 = vld [vmem:[#allocation12_spill] sm:$0xff]  ;;  %v1167_v10 = vld [vmem:[#allocation15_spill] sm:$0xff]  ;;  %192 = vmatprep.mubr.f32.mxu0 %v695_v59  ;;  %s106_s11 = scalar_lea.vmem %s1129_s0, %s471_s2  ;;  %vm697_vm0 = vmmov 0   ;;  %vm124_vm1 = vcmask 261120   ;;  %v109_v4 = vlaneseq  ;;  %s447_s14 = scalar_lea.vmem %s1134_s5, %s471_s2 }
  0x2e   : > { %v546_v61 = vpack.c.bf16 %v1165_v3, %v1164_v0  ;;  %v548_v60 = vpack.c.bf16 %v1167_v10, %v1166_v7  ;;  %v1168_v6 = vld [vmem:[#allocation11_spill] sm:$0xff]  ;;  %v1169_v9 = vld [vmem:[#allocation14_spill] sm:$0xff]  ;;  %v1171_v16 = vld [vmem:[#allocation21_spill] sm:$0xff]  ;;  %v696_v0 = vmov 0.0|0.0   ;;  %506 = vmatprep.mubr.msk.f32.mxu1 %vm697_vm0, %v695_v59  ;;  %v562_v3 = vpack.c.bf16 %v822_v22, %v807_v19  ;;  %s103_s1 = sadd.s32 1, %s690_s1  }
  0x2f   : > { %545 = vmatprep.subr.bf16.mxu0 %v544_v63  ;;  %v550_v62 = vpack.c.bf16 %v1169_v9, %v1168_v6  ;;  %v1170_v13 = vld [vmem:[#allocation18_spill] sm:$0xff]  ;;  %552 = vmatprep.subr.bf16.mxu1 %v696_v0  ;;  %v1172_v2 = vld [vmem:[#allocation7_spill] sm:$0xff]  ;;  %v1174_v8 = vld [vmem:[#allocation13_spill] sm:$0xff]  ;;  %p100_p8 = scmp.ge.s32.totalorder %s103_s1, 8  }
  0x30   : > { %547 = vmatpush1.bf16.msra.mxu0 %v546_v61  ;;  %v558_v56 = vpack.c.bf16 %v1171_v16, %v1170_v13  ;;  %v1173_v5 = vld [vmem:[#allocation10_spill] sm:$0xff]  ;;  %v1175_v11 = vld [vmem:[#allocation16_spill] sm:$0xff]  ;;  %v107_v61 = vld [vmem:[%s106_s11] sm:$0xff] }
  0x31   : > { %549 = vmatprep.subr.bf16.mxu0 %v548_v60  ;;  %v553_v63 = vpack.c.bf16 %v1173_v5, %v1172_v2  ;;  %v556_v60 = vpack.c.bf16 %v1175_v11, %v1174_v8  ;;  %v1176_v12 = vld [vmem:[#allocation17_spill] sm:$0xff]  ;;  %v1177_v15 = vld [vmem:[#allocation20_spill] sm:$0xff]  ;;  %v1178_v14 = vld [vmem:[#allocation19_spill] sm:$0xff]  ;;  %v566_v2 = vpack.c.bf16 %v852_v28, %v837_v25  ;;  %v110_v5 = vshrl.u32 %v109_v4, 7 }
  0x32   : > { %v560_v1 = vpack.c.bf16 %v1177_v15, %v1176_v12  ;;  %v1179_v17 = vld [vmem:[#allocation22_spill] sm:$0xff]  ;;  %v1183_v8 = vld [vmem:[#allocation25_spill] sm:$0xff] }
  0x33   : > { %554 = vmatpush3.bf16.msra.mxu1 %v553_v63  ;;  %v591_v63 = vpack.c.bf16 %v1179_v17, %v1178_v14  ;;  %v111_v6 = vsub.s32 0, %v110_v5  ;;  %v115_v7 = vsub.s32 1, %v110_v5 }
  0x34   : > { %551 = vmatpush1.bf16.msra.mxu0 %v550_v62  ;;  %555 = vmatprep.subr.bf16.mxu1 %v696_v0  ;;  %v564_v62 = vpack.c.bf16 %v817_v21, %v802_v18 }
  0x35   : > { %559 = vmatprep.subr.bf16.mxu0 %v558_v56  ;;  %v594_v56 = vpack.c.bf16 %v827_v23, %v812_v20 }
  0x37   : > { %472 = vmatmul.mubr.msk.f32.vlgmr.msra.gmra.mrb[0].mxu0 %vm124_vm1, %v107_v61  ;;  %557 = vmatpush3.bf16.msra.mxu1 %v556_v60  ;;  %v597_v60 = vpack.c.bf16 %v857_v29, %v842_v26 }
  0x38   : > { %561 = vmatpush1.bf16.msra.mxu0 %v560_v1  ;;  %590 = vmatprep.subr.bf16.mxu1 %v696_v0  ;;  %v568_v1 = vpack.c.bf16 %v847_v27, %v832_v24 }
  0x39   : > { %563 = vmatprep.subr.bf16.mxu0 %v562_v3  ;;  %349 = vmatprep.mubr.f32.mxu0 %v695_v59  ;;  %v570_v3 = vpack.c.bf16 %v882_v34, %v867_v31 }
  0x3a   : > { %507 = vmatmul.mubr.msk.f32.vlgmr.msra.gmra.mrb[0].mxu1 %vm124_vm1, %v107_v61  ;;  %v572_v61 = vpack.c.bf16 %v877_v33, %v862_v30 }
  0x3b   : > { %592 = vmatpush3.bf16.msra.mxu1 %v591_v63  ;;  %541 = vmatprep.mubr.msk.f32.mxu1 %vm697_vm0, %v695_v59  ;;  %v574_v59 = vpack.c.bf16 %v912_v40, %v897_v37  ;;  %v576_v63 = vpack.c.bf16 %v907_v39, %v892_v36 }
  0x3c   : > { %565 = vmatpush1.bf16.msra.mxu0 %v564_v62  ;;  %593 = vmatprep.subr.bf16.mxu1 %v696_v0  ;;  %v578_v62 = vpack.c.bf16 %v942_v46, %v927_v43 }
  0x3d   : > { %567 = vmatprep.subr.bf16.mxu0 %v566_v2  ;;  %v600_v2 = vpack.c.bf16 %v887_v35, %v872_v32 }
  0x3f   : > { %595 = vmatpush3.bf16.msra.mxu1 %v594_v56  ;;  %v603_v56 = vpack.c.bf16 %v917_v41, %v902_v38 }
  0x40   : > { %569 = vmatpush1.bf16.msra.mxu0 %v568_v1  ;;  %596 = vmatprep.subr.bf16.mxu1 %v696_v0  ;;  %v580_v1 = vpack.c.bf16 %v937_v45, %v922_v42 }
  0x41   : > { %571 = vmatprep.subr.bf16.mxu0 %v570_v3  ;;  %v582_v3 = vpack.c.bf16 %v972_v52, %v957_v49 }
  0x43   : > { %598 = vmatpush3.bf16.msra.mxu1 %v597_v60  ;;  %v606_v60 = vpack.c.bf16 %v947_v47, %v932_v44 }
  0x44   : > { %573 = vmatpush1.bf16.msra.mxu0 %v572_v61  ;;  %599 = vmatprep.subr.bf16.mxu1 %v696_v0  ;;  %v584_v61 = vpack.c.bf16 %v967_v51, %v952_v48 }
  0x45   : > { %575 = vmatprep.subr.bf16.mxu0 %v574_v59  ;;  %v586_v59 = vpack.c.bf16 %v1002_v58, %v987_v55 }
  0x47   : > { %601 = vmatpush3.bf16.msra.mxu1 %v600_v2  ;;  %v609_v2 = vpack.c.bf16 %v977_v53, %v962_v50 }
  0x48   : > { %577 = vmatpush1.bf16.msra.mxu0 %v576_v63  ;;  %602 = vmatprep.subr.bf16.mxu1 %v696_v0  ;;  %v588_v63 = vpack.c.bf16 %v997_v57, %v982_v54 }
  0x49   : > { %579 = vmatprep.subr.bf16.mxu0 %v578_v62  ;;  %v1180_v62 = vld [vmem:[#allocation23_spill] sm:$0xff] }
  0x4b   : > { %604 = vmatpush3.bf16.msra.mxu1 %v603_v56  ;;  %v1181_v56 = vld [vmem:[#allocation24_spill] sm:$0xff] }
  0x4c   : > { %581 = vmatpush1.bf16.msra.mxu0 %v580_v1  ;;  %605 = vmatprep.subr.bf16.mxu1 %v696_v0  ;;  %v612_v1 = vpack.c.bf16 %v1181_v56, %v1180_v62  ;;  %v116_v62 = vrot.slane %v1183_v8, %v115_v7 }
  0x4d   : > { %583 = vmatprep.subr.bf16.mxu0 %v582_v3  ;;  %v1182_v3 = vld [vmem:[#allocation27_spill] sm:$0xff] }
  0x4f   : > { %607 = vmatpush3.bf16.msra.mxu1 %v606_v60 }
  0x50   : > { %585 = vmatpush1.bf16.msra.mxu0 %v584_v61  ;;  %608 = vmatprep.subr.bf16.mxu1 %v696_v0 }
  0x51   : > { %587 = vmatprep.subr.bf16.mxu0 %v586_v59  ;;  %v112_v59 = vrot.slane %v1183_v8, %v111_v6 }
  0x53   : > { %610 = vmatpush3.bf16.msra.mxu1 %v609_v2  ;;  %v1184_v2 = vld [vmem:[#allocation26_spill] sm:$0xff] }
  0x54   : > { %589 = vmatpush1.bf16.msra.mxu0 %v588_v63  ;;  %611 = vmatprep.subr.bf16.mxu1 %v696_v0  ;;  %v273_v9 = vrot.slane %v1184_v2, %v111_v6  ;;  %v277_v63 = vrot.slane %v1184_v2, %v115_v7  ;;  %v119_v6 = vsub.s32 2, %v110_v5 }
  0x56   : > { %v614_v0 = vadd.f32 %v273_v9, %v112_v59  ;;  %v616_v10 = vadd.f32 %v277_v63, %v116_v62  ;;  %v281_v17 = vrot.slane %v1184_v2, %v119_v6  ;;  %v120_v9 = vrot.slane %v1183_v8, %v119_v6 }
  0x57   : > { %350 = vmatmul.mubr.f32.vlgmr.msra.gmra.mrb[0].mxu0 %v1182_v3  ;;  %613 = vmatpush3.bf16.msra.mxu1 %v612_v1 }
  0x5a   : > { %542 = vmatmul.mubr.f32.vlgmr.msra.gmra.mrb[2].mxu1 %v1182_v3 }
 0x10d   : > { %v265_v60 = vpop.f32.mrb[0].mxu1 }
 0x10e   : > { %v508_v61 = vpop.f32.mrb[1].mxu1 }
 0x12a   : > { %v351_v56 = vpop.f32.mrb[0].mxu0 }
 0x12b   : > { %v615_v1 = vadd.f32 %v614_v0, %v351_v56  ;;  %v353_v11 = vpop.f32.mrb[1].mxu0  ;;  %v266_v0 = vadd.f32 %v265_v60, %v120_v9 }
 0x12c   : > { %v617_v61 = vadd.f32 %v616_v10, %v353_v11 }
 0x12d   : > { %v474_v12 = vmul.f32 -1.442695, %v615_v1  ;;  %v422_v13 = vpop.f32.mrb[2].mxu1 }
 0x12e   : > { %v543_v14 = vpop.f32.mrb[3].mxu1  ;;  %v475_v4 = vmul.f32 -1.442695, %v617_v61  ;;  %v423_v62 = vadd.f32 %v422_v13, %v281_v17 }
 0x12f   : > { %642 = vpow2.f32 %v474_v12 }
 0x130   : > { %644 = vpow2.f32 %v475_v4 }
 0x139   : > { %v643_v15 = vpop.eup %642 }
 0x13a   : > { %v430_v16 = vadd.f32 1.0, %v643_v15  ;;  %v645_v7 = vpop.eup %644 }
 0x13b   : > { %v437_v59 = vadd.f32 1.0, %v645_v7 }
 0x13c   : > { %646 = vrcp.f32 %v430_v16 }
 0x13d   : > { %648 = vrcp.f32 %v437_v59 }
 0x146   : > { %v647_v63 = vpop.eup %646 }
 0x147   : > { %v440_v10 = vmul.f32 %v647_v63, %v423_v62  ;;  %v649_v12 = vpop.eup %648 }
 0x148   : > { %v443_v14 = vsub.f32 1.0, %v649_v12  ;;  %v445_v15 = vmul.f32 %v1182_v3, %v649_v12 }
 0x149   : > { %v441_v11 = vadd.f32 %v440_v10, %v266_v0 }
 0x14b   : > { %650 = vtanh.f32 %v441_v11 }
 0x154   :  { %102 = sbr.rel (!%p100_p8) target bundleno = 44 (0x2c), region = 61 }
 0x155   : > { %v651_v56 = vpop.eup %650 }
 0x156   : > { %v444_v5 = vmul.f32 %v651_v56, %v443_v14 }
 0x158   : > { %v446_v16 = vadd.f32 %v445_v15, %v444_v5  }
 0x15a   : > { %448 = vst [vmem:[%s447_s14] sm:$0xff] %v446_v16  ;;  %v1185_v62 = vmov %v446_v16  ;;  %449 = vst [vmem:[%s1135_s6] sm:$0xff] (%p100_p8), %v446_v16 }
 0x15b   :  { %458 = vsyncpa [#allocation3], 1 }

// kernel: seq2seq_forward.3
= control target key start
LH: loop header
LB: loop body
LE: loop exit
PB: predicated region body
PF: predicated region fallthrough
CT: control target
= control target key end

     0   :  { %v3168_v0 = vlaneseq  ;;  %s3152_s2 = inlined_call_operand.vmem [shape: f32[8,8,128], index: 2, kind: input, shape index: {}]   ;;  %s3153_s3 = inlined_call_operand.vmem [shape: f32[128,32], index: 3, kind: input, shape index: {}]   ;;  %s3154_s13 = inlined_call_operand.vmem [shape: f32[7,8,128], index: 13, kind: output, shape index: {0}]   ;;  %s3155_s14 = inlined_call_operand.vmem [shape: f32[7,8,8], index: 14, kind: output, shape index: {1}]   ;;  %s3156_s15 = inlined_call_operand.vmem [shape: f32[8,128], index: 15, kind: output, shape index: {2}]   ;;  %s3157_s4 = inlined_call_operand.vmem [shape: f32[32,384], index: 4, kind: input, shape index: {}]   ;;  %s3158_s5 = inlined_call_operand.vmem [shape: f32[128,384], index: 5, kind: input, shape index: {}]   ;;  %s3159_s6 = inlined_call_operand.vmem [shape: f32[1,384], index: 6, kind: input, shape index: {}]   ;;  %s3160_s7 = inlined_call_operand.vmem [shape: f32[1,384], index: 7, kind: input, shape index: {}]   ;;  %s3161_s8 = inlined_call_operand.vmem [shape: f32[128,128], index: 8, kind: input, shape index: {}]   ;;  %s3162_s9 = inlined_call_operand.vmem [shape: f32[128,128], index: 9, kind: input, shape index: {}]   ;;  %s3163_s10 = inlined_call_operand.vmem [shape: f32[1,128], index: 10, kind: input, shape index: {}]   ;;  %s3164_s11 = inlined_call_operand.vmem [shape: f32[128,128], index: 11, kind: input, shape index: {}]   ;;  %s3165_s0 = inlined_call_operand.vmem [shape: f32[8,128], index: 0, kind: input, shape index: {}]   ;;  %s3166_s1 = inlined_call_operand.vmem [shape: f32[8,32], index: 1, kind: input, shape index: {}]   ;;  %s3167_s12 = inlined_call_operand.vmem [shape: f32[1,128], index: 12, kind: input, shape index: {}]  }
   0x1   :  { %v2065_v1 = vld [vmem:[%s3152_s2] sm:$0xff]  ;;  %v2070_v2 = vld [vmem:[%s3152_s2 + $0x8] sm:$0xff]  ;;  %v2075_v3 = vld [vmem:[%s3152_s2 + $0x10] sm:$0xff] }
   0x2   :  { %3195 = vst [vmem:[#allocation2_spill] sm:$0xff] %v2065_v1  ;;  %3196 = vst [vmem:[#allocation3_spill] sm:$0xff] %v2070_v2  ;;  %v2080_v4 = vld [vmem:[%s3152_s2 + $0x18] sm:$0xff]  ;;  %v2085_v5 = vld [vmem:[%s3152_s2 + $0x20] sm:$0xff]  ;;  %v2093_v7 = vand.u32 127, %v3168_v0 }
   0x3   :  { %3197 = vst [vmem:[#allocation4_spill] sm:$0xff] %v2075_v3  ;;  %3198 = vst [vmem:[#allocation5_spill] sm:$0xff] %v2080_v4  ;;  %v2090_v6 = vld [vmem:[%s3152_s2 + $0x28] sm:$0xff]  ;;  %v2098_v8 = vld [vmem:[%s3152_s2 + $0x30] sm:$0xff] }
   0x4   :  { %3199 = vst [vmem:[#allocation6_spill] sm:$0xff] %v2085_v5  ;;  %3200 = vst [vmem:[#allocation7_spill] sm:$0xff] %v2090_v6  ;;  %v2103_v9 = vld [vmem:[%s3152_s2 + $0x38] sm:$0xff]  ;;  %v2108_v10 = vld [vmem:[%s3153_s3] sm:$0xff]  ;;  %s2755_s2 = smov 0  }
   0x5   :  { %3201 = vst [vmem:[#allocation8_spill] sm:$0xff] %v2093_v7  ;;  %3202 = vst [vmem:[#allocation9_spill] sm:$0xff] %v2098_v8  ;;  %v2113_v11 = vld [vmem:[%s3153_s3 + $0x8] sm:$0xff]  ;;  %v2118_v12 = vld [vmem:[%s3153_s3 + $0x10] sm:$0xff] }
   0x6   :  { %3203 = vst [vmem:[#allocation10_spill] sm:$0xff] %v2103_v9  ;;  %3204 = vst [vmem:[#allocation11_spill] sm:$0xff] %v2108_v10  ;;  %v2123_v13 = vld [vmem:[%s3153_s3 + $0x18] sm:$0xff]  ;;  %v2128_v14 = vld [vmem:[%s3153_s3 + $0x20] sm:$0xff] }
   0x7   :  { %3205 = vst [vmem:[#allocation12_spill] sm:$0xff] %v2113_v11  ;;  %3206 = vst [vmem:[#allocation13_spill] sm:$0xff] %v2118_v12  ;;  %v2133_v15 = vld [vmem:[%s3153_s3 + $0x28] sm:$0xff]  ;;  %v2138_v16 = vld [vmem:[%s3153_s3 + $0x30] sm:$0xff] }
   0x8   :  { %3207 = vst [vmem:[#allocation14_spill] sm:$0xff] %v2123_v13  ;;  %3208 = vst [vmem:[#allocation15_spill] sm:$0xff] %v2128_v14  ;;  %v2143_v17 = vld [vmem:[%s3153_s3 + $0x38] sm:$0xff]  ;;  %v2148_v18 = vld [vmem:[%s3153_s3 + $0x40] sm:$0xff] }
   0x9   :  { %3209 = vst [vmem:[#allocation16_spill] sm:$0xff] %v2133_v15  ;;  %3210 = vst [vmem:[#allocation17_spill] sm:$0xff] %v2138_v16  ;;  %v2153_v19 = vld [vmem:[%s3153_s3 + $0x48] sm:$0xff]  ;;  %v2158_v20 = vld [vmem:[%s3153_s3 + $0x50] sm:$0xff] }
   0xa   :  { %3211 = vst [vmem:[#allocation18_spill] sm:$0xff] %v2143_v17  ;;  %3212 = vst [vmem:[#allocation19_spill] sm:$0xff] %v2148_v18  ;;  %v2163_v21 = vld [vmem:[%s3153_s3 + $0x58] sm:$0xff]  ;;  %v2168_v22 = vld [vmem:[%s3153_s3 + $0x60] sm:$0xff] }
   0xb   :  { %3213 = vst [vmem:[#allocation20_spill] sm:$0xff] %v2153_v19  ;;  %3214 = vst [vmem:[#allocation21_spill] sm:$0xff] %v2158_v20  ;;  %v2173_v23 = vld [vmem:[%s3153_s3 + $0x68] sm:$0xff]  ;;  %v2178_v24 = vld [vmem:[%s3153_s3 + $0x70] sm:$0xff] }
   0xc   :  { %3215 = vst [vmem:[#allocation22_spill] sm:$0xff] %v2163_v21  ;;  %3216 = vst [vmem:[#allocation23_spill] sm:$0xff] %v2168_v22  ;;  %v2183_v25 = vld [vmem:[%s3153_s3 + $0x78] sm:$0xff]  ;;  %v2188_v26 = vld [vmem:[%s3157_s4] sm:$0xff] }
   0xd   :  { %3217 = vst [vmem:[#allocation24_spill] sm:$0xff] %v2173_v23  ;;  %3218 = vst [vmem:[#allocation25_spill] sm:$0xff] %v2178_v24  ;;  %v2193_v27 = vld [vmem:[%s3157_s4 + $0x8] sm:$0xff]  ;;  %v2198_v28 = vld [vmem:[%s3157_s4 + $0x10] sm:$0xff] }
   0xe   :  { %3219 = vst [vmem:[#allocation26_spill] sm:$0xff] %v2183_v25  ;;  %3220 = vst [vmem:[#allocation27_spill] sm:$0xff] %v2188_v26  ;;  %v2203_v29 = vld [vmem:[%s3157_s4 + $0x18] sm:$0xff]  ;;  %v2208_v30 = vld [vmem:[%s3157_s4 + $0x20] sm:$0xff] }
   0xf   :  { %3221 = vst [vmem:[#allocation28_spill] sm:$0xff] %v2193_v27  ;;  %3222 = vst [vmem:[#allocation29_spill] sm:$0xff] %v2198_v28  ;;  %v2213_v31 = vld [vmem:[%s3157_s4 + $0x28] sm:$0xff]  ;;  %v2218_v32 = vld [vmem:[%s3157_s4 + $0x30] sm:$0xff] }
  0x10   :  { %3223 = vst [vmem:[#allocation30_spill] sm:$0xff] %v2203_v29  ;;  %3224 = vst [vmem:[#allocation31_spill] sm:$0xff] %v2208_v30  ;;  %v2223_v33 = vld [vmem:[%s3157_s4 + $0x38] sm:$0xff]  ;;  %v2228_v34 = vld [vmem:[%s3157_s4 + $0x40] sm:$0xff] }
  0x11   :  { %3225 = vst [vmem:[#allocation32_spill] sm:$0xff] %v2213_v31  ;;  %3226 = vst [vmem:[#allocation33_spill] sm:$0xff] %v2218_v32  ;;  %v2233_v35 = vld [vmem:[%s3157_s4 + $0x48] sm:$0xff]  ;;  %v2238_v36 = vld [vmem:[%s3157_s4 + $0x50] sm:$0xff] }
  0x12   :  { %3227 = vst [vmem:[#allocation34_spill] sm:$0xff] %v2223_v33  ;;  %3228 = vst [vmem:[#allocation35_spill] sm:$0xff] %v2228_v34  ;;  %v2243_v37 = vld [vmem:[%s3157_s4 + $0x58] sm:$0xff]  ;;  %v2248_v38 = vld [vmem:[%s3158_s5] sm:$0xff] }
  0x13   :  { %3229 = vst [vmem:[#allocation36_spill] sm:$0xff] %v2233_v35  ;;  %3230 = vst [vmem:[#allocation37_spill] sm:$0xff] %v2238_v36  ;;  %v2253_v39 = vld [vmem:[%s3158_s5 + $0x8] sm:$0xff]  ;;  %v2258_v40 = vld [vmem:[%s3158_s5 + $0x10] sm:$0xff] }
  0x14   :  { %3231 = vst [vmem:[#allocation38_spill] sm:$0xff] %v2243_v37  ;;  %3232 = vst [vmem:[#allocation39_spill] sm:$0xff] %v2248_v38  ;;  %v2263_v41 = vld [vmem:[%s3158_s5 + $0x18] sm:$0xff]  ;;  %v2268_v42 = vld [vmem:[%s3158_s5 + $0x20] sm:$0xff] }
  0x15   :  { %3233 = vst [vmem:[#allocation40_spill] sm:$0xff] %v2253_v39  ;;  %3234 = vst [vmem:[#allocation41_spill] sm:$0xff] %v2258_v40  ;;  %v2273_v43 = vld [vmem:[%s3158_s5 + $0x28] sm:$0xff]  ;;  %v2278_v44 = vld [vmem:[%s3158_s5 + $0x30] sm:$0xff] }
  0x16   :  { %3235 = vst [vmem:[#allocation42_spill] sm:$0xff] %v2263_v41  ;;  %3236 = vst [vmem:[#allocation43_spill] sm:$0xff] %v2268_v42  ;;  %v2283_v45 = vld [vmem:[%s3158_s5 + $0x38] sm:$0xff]  ;;  %v2288_v46 = vld [vmem:[%s3158_s5 + $0x40] sm:$0xff] }
  0x17   :  { %v2293_v47 = vld [vmem:[%s3158_s5 + $0x48] sm:$0xff]  ;;  %v2298_v48 = vld [vmem:[%s3158_s5 + $0x50] sm:$0xff]  ;;  %v2303_v49 = vld [vmem:[%s3158_s5 + $0x58] sm:$0xff] }
  0x18   :  { %v2308_v50 = vld [vmem:[%s3158_s5 + $0x60] sm:$0xff]  ;;  %v2313_v51 = vld [vmem:[%s3158_s5 + $0x68] sm:$0xff]  ;;  %v2318_v52 = vld [vmem:[%s3158_s5 + $0x70] sm:$0xff] }
  0x19   :  { %v2323_v53 = vld [vmem:[%s3158_s5 + $0x78] sm:$0xff]  ;;  %v2328_v54 = vld [vmem:[%s3158_s5 + $0x80] sm:$0xff]  ;;  %v2333_v55 = vld [vmem:[%s3158_s5 + $0x88] sm:$0xff] }
  0x1a   :  { %v2338_v56 = vld [vmem:[%s3158_s5 + $0x90] sm:$0xff]  ;;  %v2343_v57 = vld [vmem:[%s3158_s5 + $0x98] sm:$0xff]  ;;  %v2348_v58 = vld [vmem:[%s3158_s5 + $0xa0] sm:$0xff] }
  0x1b   :  { %v2353_v59 = vld [vmem:[%s3158_s5 + $0xa8] sm:$0xff]  ;;  %v2358_v60 = vld [vmem:[%s3158_s5 + $0xb0] sm:$0xff]  ;;  %v2363_v61 = vld [vmem:[%s3158_s5 + $0xb8] sm:$0xff] }
  0x1c   :  { %v2368_v62 = vld [vmem:[%s3158_s5 + $0xc0] sm:$0xff]  ;;  %v2373_v63 = vld [vmem:[%s3158_s5 + $0xc8] sm:$0xff]  ;;  %v2378_v0 = vld [vmem:[%s3158_s5 + $0xd0] sm:$0xff] }
  0x1d   :  { %3237 = vst [vmem:[#allocation44_spill] sm:$0xff] %v2378_v0  ;;  %v2383_v25 = vld [vmem:[%s3158_s5 + $0xd8] sm:$0xff]  ;;  %v2388_v24 = vld [vmem:[%s3158_s5 + $0xe0] sm:$0xff]  ;;  %v2393_v23 = vld [vmem:[%s3158_s5 + $0xe8] sm:$0xff] }
  0x1e   :  { %3238 = vst [vmem:[#allocation45_spill] sm:$0xff] %v2383_v25  ;;  %3239 = vst [vmem:[#allocation46_spill] sm:$0xff] %v2388_v24  ;;  %v2398_v22 = vld [vmem:[%s3158_s5 + $0xf0] sm:$0xff]  ;;  %v2403_v21 = vld [vmem:[%s3158_s5 + $0xf8] sm:$0xff] }
  0x1f   :  { %3240 = vst [vmem:[#allocation47_spill] sm:$0xff] %v2393_v23  ;;  %3241 = vst [vmem:[#allocation48_spill] sm:$0xff] %v2398_v22  ;;  %v2408_v20 = vld [vmem:[%s3158_s5 + $0x100] sm:$0xff]  ;;  %v2413_v19 = vld [vmem:[%s3158_s5 + $0x108] sm:$0xff] }
  0x20   :  { %3242 = vst [vmem:[#allocation49_spill] sm:$0xff] %v2403_v21  ;;  %3243 = vst [vmem:[#allocation50_spill] sm:$0xff] %v2408_v20  ;;  %v2418_v18 = vld [vmem:[%s3158_s5 + $0x110] sm:$0xff]  ;;  %v2423_v17 = vld [vmem:[%s3158_s5 + $0x118] sm:$0xff] }
  0x21   :  { %3244 = vst [vmem:[#allocation51_spill] sm:$0xff] %v2413_v19  ;;  %3245 = vst [vmem:[#allocation52_spill] sm:$0xff] %v2418_v18  ;;  %v2428_v16 = vld [vmem:[%s3158_s5 + $0x120] sm:$0xff]  ;;  %v2433_v15 = vld [vmem:[%s3158_s5 + $0x128] sm:$0xff] }
  0x22   :  { %3246 = vst [vmem:[#allocation53_spill] sm:$0xff] %v2423_v17  ;;  %3247 = vst [vmem:[#allocation54_spill] sm:$0xff] %v2428_v16  ;;  %v2438_v14 = vld [vmem:[%s3158_s5 + $0x130] sm:$0xff]  ;;  %v2443_v13 = vld [vmem:[%s3158_s5 + $0x138] sm:$0xff] }
  0x23   :  { %3248 = vst [vmem:[#allocation55_spill] sm:$0xff] %v2433_v15  ;;  %3249 = vst [vmem:[#allocation56_spill] sm:$0xff] %v2438_v14  ;;  %v2448_v12 = vld [vmem:[%s3158_s5 + $0x140] sm:$0xff]  ;;  %v2453_v11 = vld [vmem:[%s3158_s5 + $0x148] sm:$0xff] }
  0x24   :  { %3250 = vst [vmem:[#allocation57_spill] sm:$0xff] %v2443_v13  ;;  %3251 = vst [vmem:[#allocation58_spill] sm:$0xff] %v2448_v12  ;;  %v2458_v10 = vld [vmem:[%s3158_s5 + $0x150] sm:$0xff]  ;;  %v2463_v7 = vld [vmem:[%s3158_s5 + $0x158] sm:$0xff] }
  0x25   :  { %3252 = vst [vmem:[#allocation59_spill] sm:$0xff] %v2453_v11  ;;  %3253 = vst [vmem:[#allocation60_spill] sm:$0xff] %v2458_v10  ;;  %v2468_v9 = vld [vmem:[%s3158_s5 + $0x160] sm:$0xff]  ;;  %v2473_v8 = vld [vmem:[%s3158_s5 + $0x168] sm:$0xff] }
  0x26   :  { %3254 = vst [vmem:[#allocation61_spill] sm:$0xff] %v2463_v7  ;;  %3255 = vst [vmem:[#allocation62_spill] sm:$0xff] %v2468_v9  ;;  %v2478_v6 = vld [vmem:[%s3158_s5 + $0x170] sm:$0xff]  ;;  %v2483_v5 = vld [vmem:[%s3158_s5 + $0x178] sm:$0xff] }
  0x27   :  { %3256 = vst [vmem:[#allocation63_spill] sm:$0xff] %v2473_v8  ;;  %3257 = vst [vmem:[#allocation64_spill] sm:$0xff] %v2478_v6  ;;  %v2488_v4 = vld [vmem:[%s3159_s6] sm:$0x7]  ;;  %v2503_v1 = vld [vmem:[%s3161_s8 + $0x8] sm:$0xff] }
  0x28   :  { %3258 = vst [vmem:[#allocation65_spill] sm:$0xff] %v2483_v5  ;;  %3259 = vst [vmem:[#allocation66_spill] sm:$0xff] %v2488_v4  ;;  %v2493_v2 = vld [vmem:[%s3160_s7] sm:$0x7]  ;;  %v2508_v5 = vld [vmem:[%s3161_s8 + $0x10] sm:$0xff] }
  0x29   :  { %3260 = vst [vmem:[#allocation67_spill] sm:$0xff] %v2493_v2  ;;  %v2498_v3 = vld [vmem:[%s3161_s8] sm:$0xff]  ;;  %3262 = vst [vmem:[#allocation69_spill] sm:$0xff] %v2503_v1  ;;  %v2513_v4 = vld [vmem:[%s3161_s8 + $0x18] sm:$0xff] }
  0x2a   :  { %3261 = vst [vmem:[#allocation68_spill] sm:$0xff] %v2498_v3  ;;  %3263 = vst [vmem:[#allocation70_spill] sm:$0xff] %v2508_v5  ;;  %v2518_v2 = vld [vmem:[%s3161_s8 + $0x20] sm:$0xff]  ;;  %v2523_v3 = vld [vmem:[%s3161_s8 + $0x28] sm:$0xff] }
  0x2b   :  { %3264 = vst [vmem:[#allocation71_spill] sm:$0xff] %v2513_v4  ;;  %3265 = vst [vmem:[#allocation72_spill] sm:$0xff] %v2518_v2  ;;  %v2528_v1 = vld [vmem:[%s3161_s8 + $0x30] sm:$0xff]  ;;  %v2533_v5 = vld [vmem:[%s3161_s8 + $0x38] sm:$0xff] }
  0x2c   :  { %3266 = vst [vmem:[#allocation73_spill] sm:$0xff] %v2523_v3  ;;  %3267 = vst [vmem:[#allocation74_spill] sm:$0xff] %v2528_v1  ;;  %v2538_v4 = vld [vmem:[%s3161_s8 + $0x40] sm:$0xff]  ;;  %v2543_v2 = vld [vmem:[%s3161_s8 + $0x48] sm:$0xff] }
  0x2d   :  { %3268 = vst [vmem:[#allocation75_spill] sm:$0xff] %v2533_v5  ;;  %3269 = vst [vmem:[#allocation76_spill] sm:$0xff] %v2538_v4  ;;  %v2548_v3 = vld [vmem:[%s3161_s8 + $0x50] sm:$0xff]  ;;  %v2553_v1 = vld [vmem:[%s3161_s8 + $0x58] sm:$0xff] }
  0x2e   :  { %3270 = vst [vmem:[#allocation77_spill] sm:$0xff] %v2543_v2  ;;  %3271 = vst [vmem:[#allocation78_spill] sm:$0xff] %v2548_v3  ;;  %v2558_v5 = vld [vmem:[%s3161_s8 + $0x60] sm:$0xff]  ;;  %v2563_v4 = vld [vmem:[%s3161_s8 + $0x68] sm:$0xff] }
  0x2f   :  { %3272 = vst [vmem:[#allocation79_spill] sm:$0xff] %v2553_v1  ;;  %3273 = vst [vmem:[#allocation80_spill] sm:$0xff] %v2558_v5  ;;  %v2568_v2 = vld [vmem:[%s3161_s8 + $0x70] sm:$0xff]  ;;  %v2573_v3 = vld [vmem:[%s3161_s8 + $0x78] sm:$0xff] }
  0x30   :  { %3274 = vst [vmem:[#allocation81_spill] sm:$0xff] %v2563_v4  ;;  %3275 = vst [vmem:[#allocation82_spill] sm:$0xff] %v2568_v2  ;;  %v2578_v1 = vld [vmem:[%s3162_s9] sm:$0xff]  ;;  %v2583_v5 = vld [vmem:[%s3162_s9 + $0x8] sm:$0xff] }
  0x31   :  { %3276 = vst [vmem:[#allocation83_spill] sm:$0xff] %v2573_v3  ;;  %3277 = vst [vmem:[#allocation84_spill] sm:$0xff] %v2578_v1  ;;  %v2588_v4 = vld [vmem:[%s3162_s9 + $0x10] sm:$0xff]  ;;  %v2593_v2 = vld [vmem:[%s3162_s9 + $0x18] sm:$0xff] }
  0x32   :  { %3278 = vst [vmem:[#allocation85_spill] sm:$0xff] %v2583_v5  ;;  %3279 = vst [vmem:[#allocation86_spill] sm:$0xff] %v2588_v4  ;;  %v2598_v3 = vld [vmem:[%s3162_s9 + $0x20] sm:$0xff]  ;;  %v2603_v1 = vld [vmem:[%s3162_s9 + $0x28] sm:$0xff] }
  0x33   :  { %3280 = vst [vmem:[#allocation87_spill] sm:$0xff] %v2593_v2  ;;  %3281 = vst [vmem:[#allocation88_spill] sm:$0xff] %v2598_v3  ;;  %v2608_v5 = vld [vmem:[%s3162_s9 + $0x30] sm:$0xff]  ;;  %v2613_v4 = vld [vmem:[%s3162_s9 + $0x38] sm:$0xff] }
  0x34   :  { %3282 = vst [vmem:[#allocation89_spill] sm:$0xff] %v2603_v1  ;;  %3283 = vst [vmem:[#allocation90_spill] sm:$0xff] %v2608_v5  ;;  %v2618_v2 = vld [vmem:[%s3162_s9 + $0x40] sm:$0xff]  ;;  %v2623_v3 = vld [vmem:[%s3162_s9 + $0x48] sm:$0xff] }
  0x35   :  { %3284 = vst [vmem:[#allocation91_spill] sm:$0xff] %v2613_v4  ;;  %3285 = vst [vmem:[#allocation92_spill] sm:$0xff] %v2618_v2  ;;  %v2628_v1 = vld [vmem:[%s3162_s9 + $0x50] sm:$0xff]  ;;  %v2633_v5 = vld [vmem:[%s3162_s9 + $0x58] sm:$0xff] }
  0x36   :  { %3286 = vst [vmem:[#allocation93_spill] sm:$0xff] %v2623_v3  ;;  %3287 = vst [vmem:[#allocation94_spill] sm:$0xff] %v2628_v1  ;;  %v2638_v4 = vld [vmem:[%s3162_s9 + $0x60] sm:$0xff]  ;;  %v2643_v2 = vld [vmem:[%s3162_s9 + $0x68] sm:$0xff] }
  0x37   :  { %3288 = vst [vmem:[#allocation95_spill] sm:$0xff] %v2633_v5  ;;  %3289 = vst [vmem:[#allocation96_spill] sm:$0xff] %v2638_v4  ;;  %v2648_v3 = vld [vmem:[%s3162_s9 + $0x70] sm:$0xff]  ;;  %v2653_v1 = vld [vmem:[%s3162_s9 + $0x78] sm:$0xff] }
  0x38   :  { %3290 = vst [vmem:[#allocation97_spill] sm:$0xff] %v2643_v2  ;;  %3291 = vst [vmem:[#allocation98_spill] sm:$0xff] %v2648_v3  ;;  %v2658_v5 = vld [vmem:[%s3163_s10] ss:$0 sm:$0xff]  ;;  %v2668_v2 = vld [vmem:[%s3164_s11 + $0x8] sm:$0xff] }
  0x39   :  { %3292 = vst [vmem:[#allocation99_spill] sm:$0xff] %v2653_v1  ;;  %3293 = vst [vmem:[#allocation100_spill] sm:$0xff] %v2658_v5  ;;  %v2663_v4 = vld [vmem:[%s3164_s11] sm:$0xff]  ;;  %v2673_v3 = vld [vmem:[%s3164_s11 + $0x10] sm:$0xff] }
  0x3a   :  { %3294 = vst [vmem:[#allocation101_spill] sm:$0xff] %v2663_v4  ;;  %3295 = vst [vmem:[#allocation102_spill] sm:$0xff] %v2668_v2  ;;  %v2678_v1 = vld [vmem:[%s3164_s11 + $0x18] sm:$0xff]  ;;  %v2683_v5 = vld [vmem:[%s3164_s11 + $0x20] sm:$0xff] }
  0x3b   :  { %3296 = vst [vmem:[#allocation103_spill] sm:$0xff] %v2673_v3  ;;  %3297 = vst [vmem:[#allocation104_spill] sm:$0xff] %v2678_v1  ;;  %v2688_v4 = vld [vmem:[%s3164_s11 + $0x28] sm:$0xff]  ;;  %v2693_v2 = vld [vmem:[%s3164_s11 + $0x30] sm:$0xff] }
  0x3c   :  { %3298 = vst [vmem:[#allocation105_spill] sm:$0xff] %v2683_v5  ;;  %3299 = vst [vmem:[#allocation106_spill] sm:$0xff] %v2688_v4  ;;  %v2698_v3 = vld [vmem:[%s3164_s11 + $0x38] sm:$0xff]  ;;  %v2703_v1 = vld [vmem:[%s3164_s11 + $0x40] sm:$0xff] }
  0x3d   :  { %3300 = vst [vmem:[#allocation107_spill] sm:$0xff] %v2693_v2  ;;  %3301 = vst [vmem:[#allocation108_spill] sm:$0xff] %v2698_v3  ;;  %v2708_v5 = vld [vmem:[%s3164_s11 + $0x48] sm:$0xff]  ;;  %v2713_v4 = vld [vmem:[%s3164_s11 + $0x50] sm:$0xff] }
  0x3e   :  { %3302 = vst [vmem:[#allocation109_spill] sm:$0xff] %v2703_v1  ;;  %3303 = vst [vmem:[#allocation110_spill] sm:$0xff] %v2708_v5  ;;  %v2718_v2 = vld [vmem:[%s3164_s11 + $0x58] sm:$0xff]  ;;  %v2723_v3 = vld [vmem:[%s3164_s11 + $0x60] sm:$0xff] }
  0x3f   :  { %3304 = vst [vmem:[#allocation111_spill] sm:$0xff] %v2713_v4  ;;  %3305 = vst [vmem:[#allocation112_spill] sm:$0xff] %v2718_v2  ;;  %v2728_v1 = vld [vmem:[%s3164_s11 + $0x68] sm:$0xff]  ;;  %v2733_v5 = vld [vmem:[%s3164_s11 + $0x70] sm:$0xff] }
  0x40   :  { %3306 = vst [vmem:[#allocation113_spill] sm:$0xff] %v2723_v3  ;;  %3307 = vst [vmem:[#allocation114_spill] sm:$0xff] %v2728_v1  ;;  %v2738_v4 = vld [vmem:[%s3164_s11 + $0x78] sm:$0xff]  ;;  %v2743_v2 = vld [vmem:[%s3167_s12] ss:$0 sm:$0xff] }
  0x41   :  { %3308 = vst [vmem:[#allocation115_spill] sm:$0xff] %v2733_v5  ;;  %3309 = vst [vmem:[#allocation116_spill] sm:$0xff] %v2738_v4  ;;  %v185_v3 = vld [vmem:[%s3165_s0] sm:$0xff]  }
  0x42   :  { %3310 = vst [vmem:[#allocation117_spill] sm:$0xff] %v2743_v2  ;;  %v186_v1 = vld [vmem:[%s3166_s1] sm:$0xff]  }
  0x43 LB: > { %3311 = vst [vmem:[#allocation118_spill] sm:$0xff] %v1970_v3  ;;  %v3312_v27 = vld [vmem:[#allocation28_spill] sm:$0xff]  ;;  %v3313_v30 = vld [vmem:[#allocation31_spill] sm:$0xff]  ;;  %v3315_v29 = vld [vmem:[#allocation30_spill] sm:$0xff]  ;;  %v3181_v9 = vmov 0.0   ;;  %vm211_vm0 = vcmask 261120   ;;  %s1974_s2 = sphi %s2755_s2, %s192_s2   ;;  %v1970_v3 = vphi %v185_v3, %v3440_v3   ;;  %v1966_v1 = vphi %v186_v1, %v1383_v1  }
  0x44   : > { %v1700_v2 = vpack.c.bf16 %v3313_v30, %v3312_v27  ;;  %v3314_v26 = vld [vmem:[#allocation27_spill] sm:$0xff]  ;;  %v3316_v33 = vld [vmem:[#allocation34_spill] sm:$0xff]  ;;  %v3317_v36 = vld [vmem:[#allocation37_spill] sm:$0xff]  ;;  %279 = vmatprep.mubr.f32.mxu0 %v3181_v9  ;;  %v3183_v30 = vmov 0.0|0.0   ;;  %vm1978_vm1 = vmmov 0   ;;  %vm688_vm2 = vcmask 1041409  }
  0x45   : > { %v1702_v4 = vpack.c.bf16 %v3315_v29, %v3314_v26  ;;  %v1704_v5 = vpack.c.bf16 %v3317_v36, %v3316_v33  ;;  %v3318_v32 = vld [vmem:[#allocation33_spill] sm:$0xff]  ;;  %v3319_v35 = vld [vmem:[#allocation36_spill] sm:$0xff]  ;;  %v3321_v42 = vld [vmem:[#allocation43_spill] sm:$0xff]  ;;  %1708 = vmatprep.subr.bf16.mxu1 %v3183_v30  ;;  %1522 = vmatprep.mubr.msk.f32.mxu1 %vm1978_vm1, %v3181_v9  ;;  %vm690_vm3 = vcmask 1042434   ;;  %vm692_vm4 = vcmask 1043459   ;;  %s1421_s0 = sshll.u32 %s1974_s2, 3 }
  0x46   : > { %1701 = vmatprep.subr.bf16.mxu0 %v1700_v2  ;;  %v1706_v8 = vpack.c.bf16 %v3319_v35, %v3318_v32  ;;  %v3320_v39 = vld [vmem:[#allocation40_spill] sm:$0xff]  ;;  %v3322_v28 = vld [vmem:[#allocation29_spill] sm:$0xff]  ;;  %v3324_v34 = vld [vmem:[#allocation35_spill] sm:$0xff]  ;;  %vm694_vm5 = vcmask 1044484   ;;  %vm696_vm6 = vcmask 1045509   ;;  %vm698_vm7 = vcmask 1046534   ;;  %s1294_s12 = scalar_lea.vmem %s3155_s14, %s1421_s0  ;;  %s1252_s29 = scalar_lea.vmem %s3154_s13, %s1421_s0 }
  0x47   : > { %1703 = vmatpush1.bf16.msra.mxu0 %v1702_v4  ;;  %v1714_v3 = vpack.c.bf16 %v3321_v42, %v3320_v39  ;;  %v3323_v31 = vld [vmem:[#allocation32_spill] sm:$0xff]  ;;  %v3325_v37 = vld [vmem:[#allocation38_spill] sm:$0xff]  ;;  %v3326_v38 = vld [vmem:[#allocation39_spill] sm:$0xff]  ;;  %vm700_vm8 = vcmask 1047559   ;;  %vm703_vm9 = vcmask 64512   ;;  %s192_s2 = sadd.s32 1, %s1974_s2  }
  0x48   : > { %1705 = vmatprep.subr.bf16.mxu0 %v1704_v5  ;;  %v1709_v27 = vpack.c.bf16 %v3323_v31, %v3322_v28  ;;  %v1712_v2 = vpack.c.bf16 %v3325_v37, %v3324_v34  ;;  %v3327_v41 = vld [vmem:[#allocation42_spill] sm:$0xff]  ;;  %v1718_v5 = vpack.c.bf16 %v2298_v48, %v2283_v45  ;;  %v3328_v40 = vld [vmem:[#allocation41_spill] sm:$0xff]  ;;  %v3332_v18 = vld [vmem:[#allocation52_spill] sm:$0xff]  ;;  %p189_p0 = scmp.ge.s32.totalorder %s192_s2, 7  }
  0x49   : > { %v1716_v4 = vpack.c.bf16 %v3327_v41, %v3326_v38  ;;  %v3329_v24 = vld [vmem:[#allocation46_spill] sm:$0xff]  ;;  %v3330_v25 = vld [vmem:[#allocation45_spill] sm:$0xff]  ;;  %v3333_v0 = vld [vmem:[#allocation44_spill] sm:$0xff] }
  0x4a   : > { %1710 = vmatpush3.bf16.msra.mxu1 %v1709_v27  ;;  %v1720_v27 = vpack.c.bf16 %v2293_v47, %v2278_v44  ;;  %v3331_v21 = vld [vmem:[#allocation49_spill] sm:$0xff]  ;;  %v3334_v23 = vld [vmem:[#allocation47_spill] sm:$0xff]  ;;  %v3335_v22 = vld [vmem:[#allocation48_spill] sm:$0xff] }
  0x4b   : > { %1707 = vmatpush1.bf16.msra.mxu0 %v1706_v8  ;;  %1711 = vmatprep.subr.bf16.mxu1 %v3183_v30  ;;  %v1747_v8 = vpack.c.bf16 %v2273_v43, %v3328_v40  ;;  %v3336_v19 = vld [vmem:[#allocation51_spill] sm:$0xff]  ;;  %v3338_v12 = vld [vmem:[#allocation58_spill] sm:$0xff]  ;;  %v3340_v17 = vld [vmem:[#allocation53_spill] sm:$0xff] }
  0x4c   : > { %1715 = vmatprep.subr.bf16.mxu0 %v1714_v3  ;;  %v1722_v3 = vpack.c.bf16 %v2328_v54, %v2313_v51  ;;  %v3337_v15 = vld [vmem:[#allocation55_spill] sm:$0xff]  ;;  %v3339_v20 = vld [vmem:[#allocation50_spill] sm:$0xff]  ;;  %v3342_v13 = vld [vmem:[#allocation57_spill] sm:$0xff] }
  0x4d   : > { %v3341_v16 = vld [vmem:[#allocation54_spill] sm:$0xff]  ;;  %v3343_v7 = vld [vmem:[#allocation61_spill] sm:$0xff]  ;;  %v3344_v6 = vld [vmem:[#allocation64_spill] sm:$0xff] }
  0x4e   : > { %1415 = vmatmul.mubr.msk.f32.vlgmr.msra.gmra.mrb[0].mxu0 %vm211_vm0, %v1966_v1  ;;  %1713 = vmatpush3.bf16.msra.mxu1 %v1712_v2  ;;  %v1750_v2 = vpack.c.bf16 %v2303_v49, %v2288_v46  ;;  %v3345_v14 = vld [vmem:[#allocation56_spill] sm:$0xff]  ;;  %v3346_v11 = vld [vmem:[#allocation59_spill] sm:$0xff] }
  0x4f   : > { %1717 = vmatpush1.bf16.msra.mxu0 %v1716_v4  ;;  %1746 = vmatprep.subr.bf16.mxu1 %v3183_v30  ;;  %v1724_v4 = vpack.c.bf16 %v2323_v53, %v2308_v50  ;;  %v3347_v10 = vld [vmem:[#allocation60_spill] sm:$0xff] }
  0x50   : > { %1719 = vmatprep.subr.bf16.mxu0 %v1718_v5  ;;  %436 = vmatprep.mubr.f32.mxu0 %v3181_v9  ;;  %v1726_v5 = vpack.c.bf16 %v2358_v60, %v2343_v57 }
  0x51   : > { %1523 = vmatmul.mubr.msk.f32.vlgmr.msra.gmra.mrb[0].mxu1 %vm211_vm0, %v1966_v1  ;;  %v1753_v1 = vpack.c.bf16 %v2333_v55, %v2318_v52 }
  0x52   : > { %1748 = vmatpush3.bf16.msra.mxu1 %v1747_v8  ;;  %1557 = vmatprep.mubr.msk.f32.mxu1 %vm1978_vm1, %v3181_v9  ;;  %v1728_v8 = vpack.c.bf16 %v2353_v59, %v2338_v56 }
  0x53   : > { %1721 = vmatpush1.bf16.msra.mxu0 %v1720_v27  ;;  %1749 = vmatprep.subr.bf16.mxu1 %v3183_v30  ;;  %v1730_v27 = vpack.c.bf16 %v3329_v24, %v2373_v63 }
  0x54   : > { %1723 = vmatprep.subr.bf16.mxu0 %v1722_v3  ;;  %v1756_v3 = vpack.c.bf16 %v2363_v61, %v2348_v58 }
  0x56   : > { %1751 = vmatpush3.bf16.msra.mxu1 %v1750_v2  ;;  %v1732_v2 = vpack.c.bf16 %v3330_v25, %v2368_v62 }
  0x57   : > { %1725 = vmatpush1.bf16.msra.mxu0 %v1724_v4  ;;  %1752 = vmatprep.subr.bf16.mxu1 %v3183_v30  ;;  %v1734_v4 = vpack.c.bf16 %v3332_v18, %v3331_v21 }
  0x58   : > { %1727 = vmatprep.subr.bf16.mxu0 %v1726_v5  ;;  %v1759_v5 = vpack.c.bf16 %v3334_v23, %v3333_v0  ;;  %v3350_v0 = vld [vmem:[#allocation65_spill] sm:$0xff] }
  0x5a   : > { %1754 = vmatpush3.bf16.msra.mxu1 %v1753_v1  ;;  %v1736_v1 = vpack.c.bf16 %v3336_v19, %v3335_v22 }
  0x5b   : > { %1729 = vmatpush1.bf16.msra.mxu0 %v1728_v8  ;;  %1755 = vmatprep.subr.bf16.mxu1 %v3183_v30  ;;  %v1738_v8 = vpack.c.bf16 %v3338_v12, %v3337_v15 }
  0x5c   : > { %1731 = vmatprep.subr.bf16.mxu0 %v1730_v27  ;;  %v1762_v27 = vpack.c.bf16 %v3340_v17, %v3339_v20 }
  0x5e   : > { %1757 = vmatpush3.bf16.msra.mxu1 %v1756_v3  ;;  %v1740_v3 = vpack.c.bf16 %v3342_v13, %v3341_v16 }
  0x5f   : > { %1733 = vmatpush1.bf16.msra.mxu0 %v1732_v2  ;;  %1758 = vmatprep.subr.bf16.mxu1 %v3183_v30  ;;  %v1742_v2 = vpack.c.bf16 %v3344_v6, %v3343_v7  ;;  %v3359_v7 = vld [vmem:[#allocation90_spill] sm:$0xff] }
  0x60   : > { %1735 = vmatprep.subr.bf16.mxu0 %v1734_v4  ;;  %v1765_v4 = vpack.c.bf16 %v3346_v11, %v3345_v14 }
  0x62   : > { %1760 = vmatpush3.bf16.msra.mxu1 %v1759_v5  ;;  %v3348_v5 = vld [vmem:[#allocation63_spill] sm:$0xff] }
  0x63   : > { %1737 = vmatpush1.bf16.msra.mxu0 %v1736_v1  ;;  %1761 = vmatprep.subr.bf16.mxu1 %v3183_v30  ;;  %v1744_v9 = vpack.c.bf16 %v3348_v5, %v3347_v10  ;;  %v3349_v1 = vld [vmem:[#allocation62_spill] sm:$0xff]  ;;  %v3360_v10 = vld [vmem:[#allocation91_spill] sm:$0xff] }
  0x64   : > { %1739 = vmatprep.subr.bf16.mxu0 %v1738_v8  ;;  %v1768_v12 = vpack.c.bf16 %v3350_v0, %v3349_v1  ;;  %v3351_v8 = vld [vmem:[#allocation118_spill] sm:$0xff]  ;;  %v3354_v0 = vld [vmem:[#allocation85_spill] sm:$0xff]  ;;  %v1780_v11 = vpack.c.bf16 %v3360_v10, %v3359_v7  ;;  %v3368_v10 = vld [vmem:[#allocation99_spill] sm:$0xff] }
  0x65   : > { %v3358_v1 = vld [vmem:[#allocation89_spill] sm:$0xff]  ;;  %v3367_v7 = vld [vmem:[#allocation98_spill] sm:$0xff] }
  0x66   : > { %1763 = vmatpush3.bf16.msra.mxu1 %v1762_v27  ;;  %v3352_v27 = vmov 0.0  }
  0x67   : > { %1741 = vmatpush1.bf16.msra.mxu0 %v1740_v3  ;;  %1764 = vmatprep.subr.bf16.mxu1 %v3183_v30  ;;  %v3353_v3 = vld [vmem:[#allocation84_spill] sm:$0xff] }
  0x68   : > { %1743 = vmatprep.subr.bf16.mxu0 %v1742_v2  ;;  %v3355_v2 = vld [vmem:[#allocation86_spill] sm:$0xff] }
  0x6a   : > { %1766 = vmatpush3.bf16.msra.mxu1 %v1765_v4  ;;  %v3356_v4 = vld [vmem:[#allocation87_spill] sm:$0xff] }
  0x6b   : > { %1745 = vmatpush1.bf16.msra.mxu0 %v1744_v9  ;;  %1767 = vmatprep.subr.bf16.mxu1 %v3183_v30  ;;  %v1771_v9 = vpack.c.bf16 %v3354_v0, %v3353_v3  ;;  %v1774_v5 = vpack.c.bf16 %v3356_v4, %v3355_v2  ;;  %v3361_v3 = vld [vmem:[#allocation92_spill] sm:$0xff]  ;;  %v3362_v0 = vld [vmem:[#allocation93_spill] sm:$0xff]  ;;  %v3363_v2 = vld [vmem:[#allocation94_spill] sm:$0xff] }
  0x6c   : > { %1770 = vmatprep.subr.bf16.mxu0 %v3183_v30  ;;  %v3364_v4 = vld [vmem:[#allocation95_spill] sm:$0xff] }
  0x6e   : > { %437 = vmatmul.mubr.f32.vlgmr.msra.gmra.mrb[0].mxu0 %v3351_v8  ;;  %1769 = vmatpush3.bf16.msra.mxu1 %v1768_v12  ;;  %v3357_v12 = vld [vmem:[#allocation88_spill] sm:$0xff] }
  0x6f   : > { %1592 = vmatprep.mubr.msk.f32.mxu0 %vm1978_vm1, %v3352_v27  ;;  %1794 = vmatprep.subr.bf16.mxu1 %v3183_v30  ;;  %v1777_v6 = vpack.c.bf16 %v3358_v1, %v3357_v12  ;;  %v3365_v12 = vld [vmem:[#allocation96_spill] sm:$0xff] }
  0x70   : > { %1772 = vmatpush3.bf16.msra.mxu0 %v1771_v9  ;;  %v1783_v9 = vpack.c.bf16 %v3362_v0, %v3361_v3 }
  0x71   : > { %1558 = vmatmul.mubr.f32.vlgmr.msra.gmra.mrb[2].mxu1 %v3351_v8  ;;  %1773 = vmatprep.subr.bf16.mxu0 %v3183_v30 }
  0x72   : > { %1627 = vmatprep.mubr.msk.f32.mxu1 %vm1978_vm1, %v3352_v27 }
  0x74   : > { %1775 = vmatpush3.bf16.msra.mxu0 %v1774_v5  ;;  %v1786_v5 = vpack.c.bf16 %v3364_v4, %v3363_v2 }
  0x75   : > { %1776 = vmatprep.subr.bf16.mxu0 %v3183_v30 }
  0x78   : > { %1778 = vmatpush3.bf16.msra.mxu0 %v1777_v6  ;;  %v3366_v6 = vld [vmem:[#allocation97_spill] sm:$0xff] }
  0x79   : > { %1779 = vmatprep.subr.bf16.mxu0 %v3183_v30  ;;  %v1789_v1 = vpack.c.bf16 %v3366_v6, %v3365_v12  ;;  %v3370_v12 = vld [vmem:[#allocation66_spill] sm:$0xff] }
  0x7c   : > { %1781 = vmatpush3.bf16.msra.mxu0 %v1780_v11  ;;  %v1792_v11 = vpack.c.bf16 %v3368_v10, %v3367_v7 }
  0x7d   : > { %1782 = vmatprep.subr.bf16.mxu0 %v3183_v30 }
  0x80   : > { %1784 = vmatpush3.bf16.msra.mxu0 %v1783_v9  ;;  %v3369_v9 = vlaneseq }
  0x81   : > { %1785 = vmatprep.subr.bf16.mxu0 %v3183_v30 }
  0x82   : > { %v2875_v2 = vshrl.u32 %v3369_v9, 7 }
  0x84   : > { %1787 = vmatpush3.bf16.msra.mxu0 %v1786_v5  ;;  %v2878_v4 = vsub.s32 0, %v2875_v2  ;;  %v2881_v5 = vsub.s32 1, %v2875_v2  ;;  %v2892_v22 = vsub.s32 2, %v2875_v2  ;;  %v3189_v41 = vsub.s32 6, %v2875_v2 }
  0x85   : > { %1788 = vmatprep.subr.bf16.mxu0 %v3183_v30 }
  0x86   : > { %v199_v6 = vrot.slane %v3370_v12, %v2878_v4 }
  0x88   : > { %1790 = vmatpush3.bf16.msra.mxu0 %v1789_v1  ;;  %v3371_v1 = vld [vmem:[#allocation67_spill] sm:$0xff] }
  0x89   : > { %1791 = vmatprep.subr.bf16.mxu0 %v3183_v30  ;;  %v3372_v7 = vmov %v3371_v1  ;;  %v360_v10 = vrot.slane %v3371_v1, %v2878_v4 }
  0x8b   : > { %v1866_v9 = vadd.f32 %v360_v10, %v199_v6  ;;  %v368_v6 = vrot.slane %v3372_v7, %v2892_v22 }
  0x8c   : > { %1793 = vmatpush3.bf16.msra.mxu0 %v1792_v11  ;;  %v203_v11 = vrot.slane %v3370_v12, %v2881_v5 }
  0x8d   : > { %1818 = vmatprep.subr.bf16.mxu0 %v3183_v30 }
 0x124   : > { %v352_v3 = vpop.f32.mrb[0].mxu1 }
 0x125   : > { %v1524_v0 = vpop.f32.mrb[1].mxu1 }
 0x126   : > { %v364_v0 = vrot.slane %v3372_v7, %v2881_v5 }
 0x128   : > { %v1868_v13 = vadd.f32 %v364_v0, %v203_v11 }
 0x141   : > { %v438_v30 = vpop.f32.mrb[0].mxu0 }
 0x142   : > { %v1867_v14 = vadd.f32 %v1866_v9, %v438_v30  ;;  %v440_v15 = vpop.f32.mrb[1].mxu0  ;;  %v207_v30 = vrot.slane %v3370_v12, %v2892_v22 }
 0x143   : > { %v1869_v18 = vadd.f32 %v1868_v13, %v440_v15 }
 0x144   : > { %v1417_v16 = vmul.f32 -1.442695, %v1867_v14  ;;  %v509_v17 = vpop.f32.mrb[2].mxu1  ;;  %v353_v15 = vadd.f32 %v352_v3, %v207_v30 }
 0x145   : > { %v1559_v19 = vpop.f32.mrb[3].mxu1  ;;  %v1418_v20 = vmul.f32 -1.442695, %v1869_v18  ;;  %v510_v11 = vadd.f32 %v509_v17, %v368_v6 }
 0x146   : > { %1904 = vpow2.f32 %v1417_v16  ;;  %v1979_v19 = vmov 1966171168  }
 0x147   : > { %1906 = vpow2.f32 %v1418_v20  ;;  %v537_v20 = vunpack.c.l.s4 %v1979_v19 }
 0x149   : > { %v538_v0 = vunpack.c.0.s8 %v537_v20 }
 0x14b   : > { %v541_v24 = vsub.s32 %v538_v0, %v2875_v2  ;;  %v3376_v0 = vld [vmem:[#allocation4_spill] sm:$0xff] }
 0x150   : > { %v1905_v21 = vpop.eup %1904 }
 0x151   : > { %v517_v1 = vadd.f32 1.0, %v1905_v21  ;;  %v1907_v10 = vpop.eup %1906 }
 0x152   : > { %v524_v14 = vadd.f32 1.0, %v1907_v10 }
 0x153   : > { %1908 = vrcp.f32 %v517_v1 }
 0x154   : > { %1910 = vrcp.f32 %v524_v14 }
 0x15d   : > { %v1909_v13 = vpop.eup %1908 }
 0x15e   : > { %v527_v16 = vmul.f32 %v1909_v13, %v510_v11  ;;  %v1911_v21 = vpop.eup %1910 }
 0x15f   : > { %v530_v9 = vsub.f32 1.0, %v1911_v21  ;;  %v532_v7 = vmul.f32 %v3351_v8, %v1911_v21 }
 0x160   : > { %v528_v18 = vadd.f32 %v527_v16, %v353_v15 }
 0x162   : > { %1912 = vtanh.f32 %v528_v18 }
 0x16c   : > { %v1913_v1 = vpop.eup %1912 }
 0x16d   : > { %v531_v23 = vmul.f32 %v1913_v1, %v530_v9 }
 0x16f   : > { %v2900_v3 = vadd.f32 %v532_v7, %v531_v23  }
 0x171   : > { %v3373_v10 = vmov %v2900_v3  ;;  %v3374_v3 = vld [vmem:[#allocation2_spill] sm:$0xff] }
 0x172   : > { %1593 = vmatmul.mubr.f32.vlgmr.msra.gmra.mrb[2].mxu0 %v3373_v10  ;;  %v542_v17 = vrot.slane %v3373_v10, %v541_v24  ;;  %v535_v6 = vcombine.high %v3373_v10, %v3373_v10  ;;  %v3375_v7 = vmov %v3374_v3  ;;  %1387 = vst [vmem:[%s3156_s15] sm:$0xff] (%p189_p0), %v3373_v10 }
 0x173   : > { %1662 = vmatprep.mubr.msk.f32.mxu0 %vm1978_vm1, %v3352_v27 }
 0x174   : > { %v558_v30 = vrot.slane %v542_v17, %v541_v24  ;;  %v550_v14 = vcombine.high %v542_v17, %v542_v17  ;;  %v549_v11 = vrot.slane %v535_v6, %v541_v24  ;;  %v3377_v6 = vld [vmem:[#allocation3_spill] sm:$0xff] }
 0x176   : > { %v587_v13 = vrot.slane %v558_v30, %v2878_v4  ;;  %v580_v8 = vcombine.high %v558_v30, %v558_v30  ;;  %v572_v15 = vrot.slane %v550_v14, %v541_v24  ;;  %v565_v16 = vrot.slane %v549_v11, %v541_v24 }
 0x177   : > { %v551_v23 = vcombine.high %v549_v11, %v549_v11  ;;  %v3378_v11 = vld [vmem:[#allocation5_spill] sm:$0xff] }
 0x178   : > { %v624_v18 = vmul.f32 %v587_v13, %v3374_v3  ;;  %v595_v19 = vrot.slane %v580_v8, %v2878_v4  ;;  %v591_v20 = vrot.slane %v572_v15, %v2878_v4  ;;  %v582_v21 = vcombine.high %v572_v15, %v572_v15  ;;  %v3379_v15 = vld [vmem:[#allocation6_spill] sm:$0xff] }
 0x179   : > { %v579_v17 = vrot.slane %v551_v23, %v541_v24  ;;  %v603_v30 = vrot.slane %v565_v16, %v2878_v4  ;;  %v581_v14 = vcombine.high %v565_v16, %v565_v16 }
 0x17a   : > { %632 = vadd.xlane.f32.xlu0 %v624_v18  ;;  %v626_v9 = vmul.f32 %v595_v19, %v3376_v0  ;;  %v599_v1 = vrot.slane %v582_v21, %v2878_v4  ;;  %v625_v12 = vmul.f32 %v591_v20, %v3377_v6  ;;  %v3380_v21 = vld [vmem:[#allocation7_spill] sm:$0xff]  ;;  %v3381_v20 = vld [vmem:[#allocation9_spill] sm:$0xff] }
 0x17b   : > { %v607_v8 = vrot.slane %v579_v17, %v2878_v4  ;;  %v583_v3 = vcombine.high %v579_v17, %v579_v17  ;;  %v628_v18 = vmul.f32 %v603_v30, %v3379_v15  ;;  %v611_v19 = vrot.slane %v581_v14, %v2878_v4  ;;  %v3383_v17 = vld [vmem:[#allocation8_spill] sm:$0xff] }
 0x17c   : > { %636 = vadd.xlane.f32.xlu1 %v626_v9  ;;  %v627_v13 = vmul.f32 %v599_v1, %v3378_v11 }
 0x17d   : > { %v629_v24 = vmul.f32 %v607_v8, %v3380_v21  ;;  %v615_v23 = vrot.slane %v583_v3, %v2878_v4  ;;  %v630_v9 = vmul.f32 %v611_v19, %v3381_v20 }
 0x17e   : > { %634 = vadd.xlane.f32.xlu0 %v625_v12  ;;  %v3382_v12 = vld [vmem:[#allocation10_spill] sm:$0xff] }
 0x17f   : > { %v631_v16 = vmul.f32 %v615_v23, %v3382_v12 }
 0x180   : > { %638 = vadd.xlane.f32.xlu1 %v627_v13  ;;  %v2926_v13 = vsub.s32 %v3383_v17, %v2875_v2 }
 0x182   : > { %640 = vadd.xlane.f32.xlu0 %v628_v18 }
 0x184   : > { %642 = vadd.xlane.f32.xlu1 %v629_v24 }
 0x186   : > { %644 = vadd.xlane.f32.xlu0 %v630_v9 }
 0x188   : > { %646 = vadd.xlane.f32.xlu1 %v631_v16 }
 0x207   : > { %v633_v1 = vpop.xlane.xlu0 %632 }
 0x208   : > { %v659_v18 = vrot.slane %v633_v1, %v2926_v13 }
 0x209   : > { %v637_v30 = vpop.xlane.xlu1 %636 }
 0x20a   : > { %v667_v3 = vrot.slane %v637_v30, %v2926_v13 }
 0x20b   : > { %v635_v14 = vpop.xlane.xlu0 %634 }
 0x20c   : > { %v663_v8 = vrot.slane %v635_v14, %v2926_v13 }
 0x20d   : > { %v639_v19 = vpop.xlane.xlu1 %638 }
 0x20e   : > { %v689_v24 = vsel %vm688_vm2, %v663_v8, %v659_v18  ;;  %v671_v23 = vrot.slane %v639_v19, %v2926_v13 }
 0x20f   : > { %v691_v9 = vsel %vm690_vm3, %v667_v3, %v689_v24  ;;  %v641_v16 = vpop.xlane.xlu0 %640 }
 0x210   : > { %v693_v25 = vsel %vm692_vm4, %v671_v23, %v691_v9  ;;  %v675_v26 = vrot.slane %v641_v16, %v2926_v13 }
 0x211   : > { %v643_v28 = vpop.xlane.xlu1 %642 }
 0x212   : > { %v695_v29 = vsel %vm694_vm5, %v675_v26, %v693_v25  ;;  %v679_v31 = vrot.slane %v643_v28, %v2926_v13  ;;  %v1980_v25 = vmov 0  }
 0x213   : > { %v645_v32 = vpop.xlane.xlu0 %644  ;;  %1903 = vset.pattern.permute.xlu0 %v1980_v25  ;;  %1902 = vset.pattern.permute.xlu1 %v1980_v25 }
 0x214   : > { %v683_v18 = vrot.slane %v645_v32, %v2926_v13  ;;  %v697_v8 = vsel %vm696_vm6, %v679_v31, %v695_v29  ;;  %v3187_v29 = vsub.s32 3, %v2875_v2 }
 0x215   : > { %v647_v33 = vpop.xlane.xlu1 %646 }
 0x216   : > { %v687_v3 = vrot.slane %v647_v33, %v2926_v13  ;;  %v699_v24 = vsel %vm698_vm7, %v683_v18, %v697_v8  ;;  %v3191_v8 = vsub.s32 4, %v2875_v2 }
 0x218   : > { %v701_v23 = vsel %vm700_vm8, %v687_v3, %v699_v24 }
 0x219   : > { %v704_v9 = vsel %vm703_vm9, %v701_v23, -inf }
 0x21a   : > { %705 = vmax.xlane.f32.xlu0 %v704_v9 }
 0x245   : > { %v2944_v26 = vpop.f32.mrb[2].mxu0 }
 0x246   : > { %v1594_v34 = vpop.f32.mrb[3].mxu0 }
 0x247   : > { %v3190_v34 = vsub.s32 5, %v2875_v2 }
 0x2a7   : > { %v706_v31 = vpop.xlane.xlu0 %705 }
 0x2a8   : > { %v711_v35 = vrot.slane %v706_v31, %v2878_v4  ;;  %v715_v36 = vrot.slane %v706_v31, %v2881_v5  ;;  %v719_v18 = vrot.slane %v706_v31, %v2892_v22  ;;  %v723_v3 = vrot.slane %v706_v31, %v3187_v29 }
 0x2a9   : > { %v727_v38 = vrot.slane %v706_v31, %v3191_v8  ;;  %v731_v42 = vrot.slane %v706_v31, %v3190_v34 }
 0x2aa   : > { %v748_v24 = vsub.f32 %v633_v1, %v711_v35  ;;  %v749_v23 = vsub.f32 %v635_v14, %v715_v36  ;;  %v750_v9 = vsub.f32 %v637_v30, %v719_v18  ;;  %v751_v39 = vsub.f32 %v639_v19, %v723_v3 }
 0x2ab   : > { %v752_v29 = vsub.f32 %v641_v16, %v727_v38  ;;  %v3188_v36 = vsub.s32 7, %v2875_v2  ;;  %v735_v1 = vrot.slane %v706_v31, %v3189_v41  ;;  %v753_v30 = vsub.f32 %v643_v28, %v731_v42 }
 0x2ac   : > { %v756_v25 = vmul.f32 1.442695, %v748_v24  ;;  %v758_v37 = vmul.f32 1.442695, %v749_v23  ;;  %v760_v40 = vmul.f32 1.442695, %v750_v9 }
 0x2ad   : > { %v762_v35 = vmul.f32 1.442695, %v751_v39  ;;  %v764_v14 = vmul.f32 1.442695, %v752_v29  ;;  %v754_v3 = vsub.f32 %v645_v32, %v735_v1  ;;  %v766_v38 = vmul.f32 1.442695, %v753_v30 }
 0x2ae   : > { %1914 = vpow2.f32 %v756_v25 }
 0x2af   : > { %1916 = vpow2.f32 %v758_v37  ;;  %v739_v37 = vrot.slane %v706_v31, %v3188_v36  ;;  %v768_v28 = vmul.f32 1.442695, %v754_v3 }
 0x2b0   : > { %1918 = vpow2.f32 %v760_v40 }
 0x2b1   : > { %1920 = vpow2.f32 %v762_v35  ;;  %v755_v40 = vsub.f32 %v647_v33, %v739_v37 }
 0x2b2   : > { %1922 = vpow2.f32 %v764_v14 }
 0x2b3   : > { %1924 = vpow2.f32 %v766_v38  ;;  %v770_v16 = vmul.f32 1.442695, %v755_v40 }
 0x2b4   : > { %1926 = vpow2.f32 %v768_v28 }
 0x2b5   : > { %1928 = vpow2.f32 %v770_v16 }
 0x2b8   : > { %v1915_v19 = vpop.eup %1914 }
 0x2b9   : > { %v2962_v18 = vpop.eup %1916  ;;  %781 = vperm.xlu1 %1902, %v1915_v19  }
 0x2ba   : > { %784 = vperm.xlu0 %1903, %v2962_v18   ;;  %v2967_v39 = vpop.eup %1918 }
 0x2bb   : > { %v2970_v42 = vpop.eup %1920 }
 0x2bc   : > { %v2973_v29 = vpop.eup %1922 }
 0x2bd   : > { %787 = vperm.xlu1 %1902, %v2967_v39   ;;  %v2976_v32 = vpop.eup %1924 }
 0x2be   : > { %v2979_v31 = vpop.eup %1926 }
 0x2bf   : > { %v2982_v33 = vpop.eup %1928 }
 0x2c1   : > { %790 = vperm.xlu1 %1902, %v2970_v42  }
 0x2c5   : > { %793 = vperm.xlu1 %1902, %v2973_v29  }
 0x2c9   : > { %796 = vperm.xlu1 %1902, %v2976_v32  }
 0x2cd   : > { %799 = vperm.xlu1 %1902, %v2979_v31  }
 0x2d1   : > { %802 = vperm.xlu1 %1902, %v2982_v33  }
 0x338   : > { %v782_v24 = vpop.permute.xlu1 %781 }
 0x339   : > { %v785_v35 = vpop.permute.xlu0 %784  ;;  %v807_v14 = vrot.slane %v782_v24, %v2926_v13 }
 0x33a   : > { %v811_v30 = vrot.slane %v785_v35, %v2926_v13 }
 0x33c   : > { %v788_v23 = vpop.permute.xlu1 %787  ;;  %v836_v28 = vsel %vm688_vm2, %v811_v30, %v807_v14 }
 0x33d   : > { %v815_v37 = vrot.slane %v788_v23, %v2926_v13 }
 0x33f   : > { %v837_v36 = vsel %vm690_vm3, %v815_v37, %v836_v28 }
 0x340   : > { %v791_v9 = vpop.permute.xlu1 %790 }
 0x341   : > { %v819_v3 = vrot.slane %v791_v9, %v2926_v13 }
 0x343   : > { %v838_v34 = vsel %vm692_vm4, %v819_v3, %v837_v36  ;;  %v3384_v36 = vsub.s32 3, %v2875_v2 }
 0x344   : > { %v794_v25 = vpop.permute.xlu1 %793 }
 0x345   : > { %v823_v38 = vrot.slane %v794_v25, %v2926_v13 }
 0x347   : > { %v839_v35 = vsel %vm694_vm5, %v823_v38, %v838_v34 }
 0x348   : > { %v797_v1 = vpop.permute.xlu1 %796 }
 0x349   : > { %v827_v16 = vrot.slane %v797_v1, %v2926_v13 }
 0x34b   : > { %v840_v23 = vsel %vm696_vm6, %v827_v16, %v839_v35 }
 0x34c   : > { %v800_v40 = vpop.permute.xlu1 %799 }
 0x34d   : > { %v831_v41 = vrot.slane %v800_v40, %v2926_v13 }
 0x34f   : > { %v841_v25 = vsel %vm698_vm7, %v831_v41, %v840_v23  ;;  %v3385_v41 = vsub.s32 4, %v2875_v2 }
 0x350   : > { %v803_v24 = vpop.permute.xlu1 %802 }
 0x351   : > { %v835_v9 = vrot.slane %v803_v24, %v2926_v13 }
 0x353   : > { %v842_v8 = vsel %vm700_vm8, %v835_v9, %v841_v25 }
 0x354   : > { %v844_v30 = vsel %vm703_vm9, %v842_v8, 0.0 }
 0x355   : > { %845 = vadd.xlane.f32.xlu1 %v844_v30 }
 0x3e2   : > { %v846_v1 = vpop.xlane.xlu1 %845 }
 0x3e3   : > { %v851_v14 = vrot.slane %v846_v1, %v2878_v4  ;;  %v855_v37 = vrot.slane %v846_v1, %v2881_v5  ;;  %v859_v34 = vrot.slane %v846_v1, %v2892_v22  ;;  %v863_v3 = vrot.slane %v846_v1, %v3384_v36  ;;  %v3390_v36 = vld [vmem:[#allocation69_spill] sm:$0xff] }
 0x3e4   : > { %v867_v40 = vrot.slane %v846_v1, %v3385_v41  ;;  %v3386_v4 = vsub.s32 5, %v2875_v2  ;;  %v3387_v22 = vsub.s32 6, %v2875_v2  ;;  %v3391_v41 = vmov 0.0|0.0  }
 0x3e5   : > { %1930 = vrcp.f32 %v851_v14 }
 0x3e6   : > { %1932 = vrcp.f32 %v855_v37  ;;  %v871_v5 = vrot.slane %v846_v1, %v3386_v4  ;;  %v875_v24 = vrot.slane %v846_v1, %v3387_v22  ;;  %v3399_v22 = vld [vmem:[#allocation77_spill] sm:$0xff] }
 0x3e7   : > { %1934 = vrcp.f32 %v859_v34  ;;  %v3389_v34 = vld [vmem:[#allocation68_spill] sm:$0xff] }
 0x3e8   : > { %1936 = vrcp.f32 %v863_v3  ;;  %v1795_v3 = vpack.c.bf16 %v3390_v36, %v3389_v34  ;;  %v3406_v34 = vld [vmem:[#allocation101_spill] sm:$0xff]  ;;  %v3407_v36 = vld [vmem:[#allocation102_spill] sm:$0xff] }
 0x3e9   : > { %1938 = vrcp.f32 %v867_v40 }
 0x3ea   : > { %1940 = vrcp.f32 %v871_v5  ;;  %1796 = vmatpush3.bf16.msra.mxu1 %v1795_v3  ;;  %v3396_v5 = vld [vmem:[#allocation74_spill] sm:$0xff]  ;;  %v1819_v3 = vpack.c.bf16 %v3407_v36, %v3406_v34 }
 0x3eb   : > { %1942 = vrcp.f32 %v875_v24  ;;  %1797 = vmatprep.subr.bf16.mxu1 %v3391_v41 }
 0x3ec   : > { %1820 = vmatpush3.bf16.msra.mxu0 %v1819_v3 }
 0x3ed   : > { %1821 = vmatprep.subr.bf16.mxu0 %v3391_v41 }
 0x3ef   : > { %v1931_v38 = vpop.eup %1930 }
 0x3f0   : > { %v889_v8 = vmul.f32 %v1931_v38, %v1915_v19  ;;  %v1933_v28 = vpop.eup %1932  ;;  %v3388_v19 = vsub.s32 7, %v2875_v2  ;;  %v3392_v2 = vld [vmem:[#allocation70_spill] sm:$0xff] }
 0x3f1   : > { %v891_v16 = vmul.f32 %v1933_v28, %v2962_v18  ;;  %v1935_v35 = vpop.eup %1934  ;;  %v3395_v28 = vld [vmem:[#allocation73_spill] sm:$0xff] }
 0x3f2   : > { %906 = vperm.xlu0 %1903, %v889_v8   ;;  %v893_v23 = vmul.f32 %v1935_v35, %v2967_v39  ;;  %v1937_v9 = vpop.eup %1936  ;;  %v879_v25 = vrot.slane %v846_v1, %v3388_v19  ;;  %v3393_v1 = vld [vmem:[#allocation71_spill] sm:$0xff] }
 0x3f3   : > { %v895_v30 = vmul.f32 %v1937_v9, %v2970_v42  ;;  %v1939_v14 = vpop.eup %1938  ;;  %v1798_v42 = vpack.c.bf16 %v3393_v1, %v3392_v2  ;;  %v3401_v9 = vld [vmem:[#allocation79_spill] sm:$0xff]  ;;  %v3410_v1 = vld [vmem:[#allocation105_spill] sm:$0xff] }
 0x3f4   : > { %1944 = vrcp.f32 %v879_v25  ;;  %v897_v18 = vmul.f32 %v1939_v14, %v2973_v29  ;;  %v1941_v37 = vpop.eup %1940  ;;  %v3394_v29 = vld [vmem:[#allocation72_spill] sm:$0xff]  ;;  %v3403_v25 = vld [vmem:[#allocation81_spill] sm:$0xff]  ;;  %v3404_v14 = vld [vmem:[#allocation82_spill] sm:$0xff] }
 0x3f5   : > { %v899_v39 = vmul.f32 %v1941_v37, %v2976_v32  ;;  %v1943_v38 = vpop.eup %1942  ;;  %1799 = vmatpush3.bf16.msra.mxu1 %v1798_v42  ;;  %v1801_v4 = vpack.c.bf16 %v3395_v28, %v3394_v29  ;;  %v3411_v42 = vld [vmem:[#allocation106_spill] sm:$0xff]  ;;  %v3413_v29 = vld [vmem:[#allocation108_spill] sm:$0xff] }
 0x3f6   : > { %911 = vperm.xlu0 %1903, %v891_v16   ;;  %v901_v40 = vmul.f32 %v1943_v38, %v2979_v31  ;;  %1800 = vmatprep.subr.bf16.mxu1 %v3391_v41  ;;  %v3397_v16 = vld [vmem:[#allocation75_spill] sm:$0xff]  ;;  %v3398_v31 = vld [vmem:[#allocation76_spill] sm:$0xff] }
 0x3f7   : > { %v1804_v35 = vpack.c.bf16 %v3397_v16, %v3396_v5  ;;  %v1807_v24 = vpack.c.bf16 %v3399_v22, %v3398_v31  ;;  %v3409_v38 = vld [vmem:[#allocation104_spill] sm:$0xff] }
 0x3f9   : > { %1802 = vmatpush3.bf16.msra.mxu1 %v1801_v4 }
 0x3fa   : > { %916 = vperm.xlu0 %1903, %v893_v23   ;;  %1803 = vmatprep.subr.bf16.mxu1 %v3391_v41  ;;  %v3400_v23 = vld [vmem:[#allocation78_spill] sm:$0xff] }
 0x3fb   : > { %v1810_v19 = vpack.c.bf16 %v3401_v9, %v3400_v23 }
 0x3fd   : > { %1805 = vmatpush3.bf16.msra.mxu1 %v1804_v35 }
 0x3fe   : > { %921 = vperm.xlu0 %1903, %v895_v30   ;;  %v1945_v8 = vpop.eup %1944  ;;  %1806 = vmatprep.subr.bf16.mxu1 %v3391_v41 }
 0x3ff   : > { %v903_v32 = vmul.f32 %v1945_v8, %v2982_v33  ;;  %v3402_v33 = vld [vmem:[#allocation80_spill] sm:$0xff]  ;;  %v3412_v8 = vld [vmem:[#allocation107_spill] sm:$0xff] }
 0x400   : > { %v1813_v30 = vpack.c.bf16 %v3403_v25, %v3402_v33  ;;  %v1828_v28 = vpack.c.bf16 %v3413_v29, %v3412_v8 }
 0x401   : > { %1808 = vmatpush3.bf16.msra.mxu1 %v1807_v24 }
 0x402   : > { %926 = vperm.xlu0 %1903, %v897_v18   ;;  %1809 = vmatprep.subr.bf16.mxu1 %v3391_v41  ;;  %v3405_v18 = vld [vmem:[#allocation83_spill] sm:$0xff] }
 0x403   : > { %v1816_v37 = vpack.c.bf16 %v3405_v18, %v3404_v14 }
 0x405   : > { %1811 = vmatpush3.bf16.msra.mxu1 %v1810_v19 }
 0x406   : > { %931 = vperm.xlu0 %1903, %v899_v39   ;;  %1812 = vmatprep.subr.bf16.mxu1 %v3391_v41  ;;  %v3408_v39 = vld [vmem:[#allocation103_spill] sm:$0xff] }
 0x407   : > { %v1822_v2 = vpack.c.bf16 %v3409_v38, %v3408_v39 }
 0x409   : > { %1814 = vmatpush3.bf16.msra.mxu1 %v1813_v30  ;;  %1823 = vmatpush3.bf16.msra.mxu0 %v1822_v2 }
 0x40a   : > { %936 = vperm.xlu0 %1903, %v901_v40   ;;  %1815 = vmatprep.subr.bf16.mxu1 %v3391_v41  ;;  %v1825_v40 = vpack.c.bf16 %v3411_v42, %v3410_v1 }
 0x40b   : > { %1824 = vmatprep.subr.bf16.mxu0 %v3391_v41 }
 0x40d   : > { %1817 = vmatpush3.bf16.msra.mxu1 %v1816_v37  ;;  %1826 = vmatpush3.bf16.msra.mxu0 %v1825_v40 }
 0x40e   : > { %941 = vperm.xlu0 %1903, %v903_v32   ;;  %1842 = vmatprep.subr.bf16.mxu1 %v3391_v41 }
 0x40f   : > { %1827 = vmatprep.subr.bf16.mxu0 %v3391_v41 }
 0x411   : > { %1829 = vmatpush3.bf16.msra.mxu0 %v1828_v28 }
 0x412   : > { %1830 = vmatprep.subr.bf16.mxu0 %v3391_v41 }
 0x471   : > { %v907_v4 = vpop.permute.xlu0 %906 }
 0x472   : > { %v944_v35 = vmul.f32 %v907_v4, %v3375_v7  ;;  %v1257_v29 = vrot.slane %v907_v4, %v2926_v13 }
 0x474   : > { %v952_v9 = vrot.slane %v944_v35, 4 }
 0x475   : > { %v912_v32 = vpop.permute.xlu0 %911 }
 0x476   : > { %v945_v5 = vmul.f32 %v912_v32, %v3377_v6  ;;  %v953_v18 = vadd.f32 %v952_v9, %v944_v35  ;;  %v1261_v38 = vrot.slane %v912_v32, %v2926_v13 }
 0x478   : > { %v958_v22 = vrot.slane %v945_v5, 4  ;;  %v954_v42 = vrot.slane %v953_v18, 2  ;;  %v1286_v9 = vsel %vm688_vm2, %v1261_v38, %v1257_v29 }
 0x479   : > { %v917_v16 = vpop.permute.xlu0 %916 }
 0x47a   : > { %v946_v31 = vmul.f32 %v917_v16, %v3376_v0  ;;  %v959_v25 = vadd.f32 %v958_v22, %v945_v5  ;;  %v1265_v8 = vrot.slane %v917_v16, %v2926_v13 }
 0x47c   : > { %v964_v19 = vrot.slane %v946_v31, 4  ;;  %v960_v3 = vrot.slane %v959_v25, 2  ;;  %v1287_v16 = vsel %vm690_vm3, %v1265_v8, %v1286_v9 }
 0x47d   : > { %v922_v24 = vpop.permute.xlu0 %921 }
 0x47e   : > { %v947_v23 = vmul.f32 %v922_v24, %v3378_v11  ;;  %v965_v37 = vadd.f32 %v964_v19, %v946_v31  ;;  %v961_v22 = vadd.f32 %v960_v3, %v959_v25  ;;  %v1269_v35 = vrot.slane %v922_v24, %v2926_v13 }
 0x480   : > { %v970_v33 = vrot.slane %v947_v23, 4  ;;  %v966_v40 = vrot.slane %v965_v37, 2  ;;  %v962_v6 = vrot.slane %v961_v22, 1  ;;  %v1288_v38 = vsel %vm692_vm4, %v1269_v35, %v1287_v16 }
 0x481   : > { %v927_v30 = vpop.permute.xlu0 %926 }
 0x482   : > { %v948_v14 = vmul.f32 %v927_v30, %v3379_v15  ;;  %v971_v34 = vadd.f32 %v970_v33, %v947_v23  ;;  %v1273_v32 = vrot.slane %v927_v30, %v2926_v13  ;;  %v963_v9 = vadd.f32 %v962_v6, %v961_v22 }
 0x484   : > { %v976_v36 = vrot.slane %v948_v14, 4  ;;  %v972_v28 = vrot.slane %v971_v34, 2  ;;  %v1289_v29 = vsel %vm694_vm5, %v1273_v32, %v1288_v38 }
 0x485   : > { %v932_v39 = vpop.permute.xlu0 %931 }
 0x486   : > { %v977_v2 = vadd.f32 %v976_v36, %v948_v14  ;;  %v949_v1 = vmul.f32 %v932_v39, %v3380_v21  ;;  %v955_v14 = vadd.f32 %v954_v42, %v953_v18  ;;  %v967_v36 = vadd.f32 %v966_v40, %v965_v37 }
 0x487   : > { %v1277_v4 = vrot.slane %v932_v39, %v2926_v13  ;;  %v973_v0 = vadd.f32 %v972_v28, %v971_v34 }
 0x488   : > { %v982_v5 = vrot.slane %v949_v1, 4  ;;  %v978_v31 = vrot.slane %v977_v2, 2  ;;  %v956_v40 = vrot.slane %v955_v14, 1  ;;  %v968_v39 = vrot.slane %v967_v36, 1 }
 0x489   : > { %v937_v23 = vpop.permute.xlu0 %936  ;;  %v1290_v34 = vsel %vm696_vm6, %v1277_v4, %v1289_v29  ;;  %v974_v28 = vrot.slane %v973_v0, 1 }
 0x48a   : > { %v983_v19 = vadd.f32 %v982_v5, %v949_v1  ;;  %v950_v33 = vmul.f32 %v937_v23, %v3381_v20  ;;  %v1281_v24 = vrot.slane %v937_v23, %v2926_v13  ;;  %v979_v30 = vadd.f32 %v978_v31, %v977_v2 }
 0x48b   : > { %v969_v16 = vadd.f32 %v968_v39, %v967_v36  ;;  %v957_v4 = vadd.f32 %v956_v40, %v955_v14  ;;  %v3416_v39 = vld [vmem:[#allocation111_spill] sm:$0xff] }
 0x48c   : > { %v984_v25 = vrot.slane %v983_v19, 2  ;;  %v988_v3 = vrot.slane %v950_v33, 4  ;;  %v1291_v5 = vsel %vm698_vm7, %v1281_v24, %v1290_v34  ;;  %v980_v31 = vrot.slane %v979_v30, 1 }
 0x48d   : > { %v942_v1 = vpop.permute.xlu0 %941 }
 0x48e   : > { %v985_v18 = vadd.f32 %v984_v25, %v983_v19  ;;  %v989_v37 = vadd.f32 %v988_v3, %v950_v33  ;;  %v951_v42 = vmul.f32 %v942_v1, %v3382_v12  ;;  %v1285_v8 = vrot.slane %v942_v1, %v2926_v13 }
 0x48f   : > { %v975_v25 = vadd.f32 %v974_v28, %v973_v0  ;;  %v981_v13 = vadd.f32 %v980_v31, %v979_v30  ;;  %v1078_v1 = vsel %vm688_vm2, %v963_v9, %v957_v4  ;;  %v3414_v30 = vld [vmem:[#allocation109_spill] sm:$0xff]  ;;  %v3421_v31 = vld [vmem:[#allocation116_spill] sm:$0xff] }
 0x490   : > { %v990_v2 = vrot.slane %v989_v37, 2  ;;  %v994_v35 = vrot.slane %v951_v42, 4  ;;  %v1292_v23 = vsel %vm700_vm8, %v1285_v8, %v1291_v5  ;;  %v986_v32 = vrot.slane %v985_v18, 1  ;;  %v3417_v8 = vld [vmem:[#allocation112_spill] sm:$0xff]  ;;  %v3419_v5 = vld [vmem:[#allocation114_spill] sm:$0xff] }
 0x491   : > { %1295 = vst.msk [vmem:[%s1294_s12] sm:$0xff] %vm703_vm9, %v1292_v23  ;;  %v1079_v34 = vsel %vm690_vm3, %v969_v16, %v1078_v1  ;;  %v1834_v28 = vpack.c.bf16 %v3417_v8, %v3416_v39  ;;  %v3426_v39 = vld [vmem:[#allocation13_spill] sm:$0xff]  ;;  %v3427_v8 = vld [vmem:[#allocation14_spill] sm:$0xff] }
 0x492   : > { %v991_v19 = vadd.f32 %v990_v2, %v989_v37  ;;  %v995_v33 = vadd.f32 %v994_v35, %v951_v42  ;;  %v987_v29 = vadd.f32 %v986_v32, %v985_v18  ;;  %v1080_v6 = vsel %vm692_vm4, %v975_v25, %v1079_v34  ;;  %v3415_v18 = vld [vmem:[#allocation110_spill] sm:$0xff]  ;;  %v3418_v2 = vld [vmem:[#allocation113_spill] sm:$0xff] }
 0x493   : > { %v1081_v37 = vsel %vm694_vm5, %v981_v13, %v1080_v6  ;;  %v1831_v40 = vpack.c.bf16 %v3415_v18, %v3414_v30  ;;  %v1837_v35 = vpack.c.bf16 %v3419_v5, %v3418_v2  ;;  %v3423_v25 = vld [vmem:[#allocation117_spill] sm:$0xff]  ;;  %v3424_v30 = vld [vmem:[#allocation11_spill] sm:$0xff]  ;;  %v3425_v18 = vld [vmem:[#allocation12_spill] sm:$0xff] }
 0x494   : > { %v992_v3 = vrot.slane %v991_v19, 1  ;;  %v996_v38 = vrot.slane %v995_v33, 2  ;;  %v1082_v36 = vsel %vm696_vm6, %v987_v29, %v1081_v37  ;;  %v3428_v2 = vld [vmem:[#allocation15_spill] sm:$0xff]  ;;  %v3429_v5 = vld [vmem:[#allocation16_spill] sm:$0xff] }
 0x495   : > { %1832 = vmatpush3.bf16.msra.mxu0 %v1831_v40  ;;  %v1843_v40 = vpack.c.bf16 %v3425_v18, %v3424_v30  ;;  %v1981_v30 = vmov 1.0  }
 0x496   : > { %v997_v24 = vadd.f32 %v996_v38, %v995_v33  ;;  %v993_v7 = vadd.f32 %v992_v3, %v991_v19  ;;  %1833 = vmatprep.subr.bf16.mxu0 %v3391_v41  ;;  %v3422_v19 = vld [vmem:[#allocation100_spill] sm:$0xff] }
 0x498   : > { %v998_v22 = vrot.slane %v997_v24, 1  ;;  %v1083_v0 = vsel %vm698_vm7, %v993_v7, %v1082_v36  ;;  %v3420_v7 = vld [vmem:[#allocation115_spill] sm:$0xff] }
 0x499   : > { %1835 = vmatpush3.bf16.msra.mxu0 %v1834_v28  ;;  %v1840_v23 = vpack.c.bf16 %v3421_v31, %v3420_v7  ;;  %v1846_v28 = vpack.c.bf16 %v3427_v8, %v3426_v39  ;;  %v3430_v7 = vld [vmem:[#allocation17_spill] sm:$0xff]  ;;  %v3431_v31 = vld [vmem:[#allocation18_spill] sm:$0xff] }
 0x49a   : > { %v999_v42 = vadd.f32 %v998_v22, %v997_v24  ;;  %1836 = vmatprep.subr.bf16.mxu0 %v3391_v41 }
 0x49c   : > { %v1084_v14 = vsel %vm700_vm8, %v999_v42, %v1083_v0 }
 0x49d   : > { %1628 = vmatmul.mubr.f32.vlgmr.msra.gmra.mrb[4].mxu1 %v1084_v14  ;;  %1838 = vmatpush3.bf16.msra.mxu0 %v1837_v35  ;;  %v1849_v35 = vpack.c.bf16 %v3429_v5, %v3428_v2 }
 0x49e   : > { %1697 = vmatprep.mubr.msk.f32.mxu1 %vm1978_vm1, %v3352_v27  ;;  %1839 = vmatprep.subr.bf16.mxu0 %v3391_v41 }
 0x49f   : > { %1844 = vmatpush3.bf16.msra.mxu1 %v1843_v40 }
 0x4a0   : > { %1845 = vmatprep.subr.bf16.mxu1 %v3391_v41 }
 0x4a1   : > { %1841 = vmatpush3.bf16.msra.mxu0 %v1840_v23  ;;  %v1852_v23 = vpack.c.bf16 %v3431_v31, %v3430_v7 }
 0x4a3   : > { %1847 = vmatpush3.bf16.msra.mxu1 %v1846_v28 }
 0x4a4   : > { %1848 = vmatprep.subr.bf16.mxu1 %v3391_v41 }
 0x4a7   : > { %1850 = vmatpush3.bf16.msra.mxu1 %v1849_v35 }
 0x4a8   : > { %1851 = vmatprep.subr.bf16.mxu1 %v3391_v41 }
 0x4ab   : > { %1853 = vmatpush3.bf16.msra.mxu1 %v1852_v23 }
 0x4ac   : > { %1854 = vmatprep.subr.bf16.mxu1 %v3391_v41 }
 0x570   : > { %v1152_v27 = vpop.f32.mrb[4].mxu1 }
 0x571   : > { %v1153_v9 = vadd.f32 %v1152_v27, %v2944_v26  ;;  %v1629_v32 = vpop.f32.mrb[5].mxu1  ;;  %v3432_v27 = vld [vmem:[#allocation19_spill] sm:$0xff] }
 0x573   : > { %v1162_v33 = vadd.f32 %v3422_v19, %v1153_v9  ;;  %v3433_v9 = vld [vmem:[#allocation20_spill] sm:$0xff]  ;;  %v3434_v19 = vld [vmem:[#allocation21_spill] sm:$0xff] }
 0x574   : > { %v1855_v32 = vpack.c.bf16 %v3433_v9, %v3432_v27 }
 0x575   : > { %1946 = vtanh.f32 %v1162_v33  ;;  %v3435_v33 = vld [vmem:[#allocation22_spill] sm:$0xff] }
 0x576   : > { %1856 = vmatpush3.bf16.msra.mxu1 %v1855_v32 }
 0x577   : > { %1857 = vmatprep.subr.bf16.mxu1 %v3391_v41 }
 0x57f   : > { %v1947_v16 = vpop.eup %1946 }
 0x580   : > { %1663 = vmatmul.mubr.f32.vlgmr.msra.gmra.mrb[4].mxu0 %v1947_v16  ;;  %v1858_v16 = vpack.c.bf16 %v3435_v33, %v3434_v19 }
 0x582   : > { %1859 = vmatpush3.bf16.msra.mxu1 %v1858_v16 }
 0x583   : > { %1860 = vmatprep.subr.bf16.mxu1 %v3391_v41 }
 0x653   : > { %v1236_v4 = vpop.f32.mrb[4].mxu0 }
 0x654   : > { %v1237_v3 = vadd.f32 %v3423_v25, %v1236_v4  ;;  %v1664_v38 = vpop.f32.mrb[5].mxu0  ;;  %v3436_v4 = vld [vmem:[#allocation23_spill] sm:$0xff]  ;;  %v3437_v25 = vld [vmem:[#allocation24_spill] sm:$0xff] }
 0x656   : > { %1240 = vmax.xlane.f32.xlu1 %v1237_v3 }
 0x6e3   : > { %v1241_v13 = vpop.xlane.xlu1 %1240 }
 0x6e4   : > { %v1242_v1 = vsub.f32 %v1237_v3, %v1241_v13 }
 0x6e6   : > { %v1243_v29 = vmul.f32 1.442695, %v1242_v1 }
 0x6e8   : > { %1948 = vpow2.f32 %v1243_v29 }
 0x6f2   : > { %v1949_v24 = vpop.eup %1948 }
 0x6f3   : > { %1245 = vadd.xlane.f32.xlu0 %v1949_v24  ;;  %v3438_v24 = vld [vmem:[#allocation25_spill] sm:$0xff] }
 0x780   : > { %v1246_v34 = vpop.xlane.xlu0 %1245 }
 0x781   : > { %1950 = vlog2.f32 %v1246_v34  ;;  %v3439_v34 = vld [vmem:[#allocation26_spill] sm:$0xff] }
 0x78b   : > { %v1951_v26 = vpop.eup %1950 }
 0x78c   : > { %v1248_v6 = vmul.f32 0.6931472, %v1951_v26  ;;  %v1864_v26 = vpack.c.bf16 %v3439_v34, %v3438_v24 }
 0x78e   : > { %v1249_v22 = vadd.f32 %v1248_v6, %v1241_v13 }
 0x790   : > { %v1250_v37 = vsub.f32 %v1237_v3, %v1249_v22  ;;  %v1861_v3 = vpack.c.bf16 %v3437_v25, %v3436_v4 }
 0x792   : > { %1296 = vmax.xlane.f32.xlu1 %v1250_v37  ;;  %1253 = vst [vmem:[%s1252_s29] sm:$0xff] %v1250_v37  ;;  %1862 = vmatpush3.bf16.msra.mxu1 %v1861_v3  ;;  %v3440_v3 = vmov %v3373_v10 }
 0x793   : > { %1863 = vmatprep.subr.bf16.mxu1 %v3391_v41 }
 0x796   : > { %1865 = vmatpush3.bf16.msra.mxu1 %v1864_v26 }
 0x81f   : > { %v1297_v42 = vpop.xlane.xlu1 %1296 }
 0x820   : > { %vm1298_vm10 = vcmp.eq.f32.partialorder %v1250_v37, %v1297_v42 }
 0x821   : > { %v1299_v36 = vsel %vm1298_vm10, %v3383_v17, 128 }
 0x822   : > { %v1301_v0 = vshra.s32 %v1299_v36, 16  ;;  %v1300_v38 = vand.u32 65535, %v1299_v36 }
 0x824   : > { %v1303_v14 = vcvt.s32.f32 %v1301_v0  ;;  %v1302_v13 = vcvt.s32.f32 %v1300_v38 }
 0x826   : > { %1304 = vmin.xlane.f32.xlu1 %v1303_v14 }
 0x8b3   : > { %v1305_v1 = vpop.xlane.xlu1 %1304 }
 0x8b4   : > { %vm1306_vm11 = vcmp.eq.f32.partialorder %v1303_v14, %v1305_v1  ;;  %v1311_v6 = vcvt.f32.s32 %v1305_v1 }
 0x8b5   : > { %v1307_v29 = vsel %vm1306_vm11, %v1302_v13, inf }
 0x8b6   : > { %1308 = vmin.xlane.f32.xlu1 %v1307_v29  ;;  %v1312_v37 = vshll.u32 %v1311_v6, 16 }
 0x943   : > { %v1309_v22 = vpop.xlane.xlu1 %1308 }
 0x944   : > { %v1310_v42 = vcvt.f32.s32 %v1309_v22 }
 0x946   : > { %v1313_v0 = vadd.s32 %v1312_v37, %v1310_v42 }
 0x948   : > { %vm1314_vm12 = vcmp.eq.s32.totalorder %v3383_v17, %v1313_v0 }
 0x949   : > { %1698 = vmatmul.mubr.msk.f32.vlgmr.msra.gmra.mrb[6].mxu1 %vm1314_vm12, %v1981_v30 }
 0xa17   :  { %191 = sbr.rel (!%p189_p0) target bundleno = 67 (0x43), region = 97 }
 0xa1c   : > { %v1383_v1 = vpop.f32.mrb[6].mxu1  }
 0xa1d   : > { %v1699_v41 = vpop.f32.mrb[7].mxu1 }

</bundles_post_ra>
